<compile_context>
chip_gen: v7x
topology: tpu7x:2x2x1
jax: 0.10.0
libtpu: 0.0.40
codegen_flags: <defaults>
</compile_context>

<pallas_src>
import numpy as np
import jax
import jax.numpy as jnp
from jax.experimental import pallas as pl
from jax.experimental.pallas import tpu as pltpu

# ----- model constants (from the PyTorch module) ----------------------------
N_TAXELS = 39          # cfg_s[0]
C_IN, C_OUT = 2, 64    # cfg_cnn[0]
H1, H2 = 128, 256      # cfg_fc
NUM_CLASSES = 36
K_HOPS = 3             # TAGConv K
DECAY = 0.2
THRESH = 0.5

XIN = N_TAXELS * C_IN          # 78   flattened per-timestep input
XIN_PAD = 128                  # lane-aligned pad of the 78 input features
FC1_IN = N_TAXELS * C_OUT      # 2496 flattened conv spikes
FC1_PAD = 2560                 # 20 * 128, lane-aligned
H3_PAD = 128                   # lane-dense padding of the 36-class head


# ---------------------------------------------------------------------------
# Fused recurrent kernel: conv-as-matmul + LIF + fc1/fc2/fc3, loop over time
# ---------------------------------------------------------------------------
def _make_fused_kernel(T):
    inv_T = 1.0 / float(T)

    def kernel(x_ref, wconv_ref, bconv_ref,
               w1_ref, b1_ref, w2_ref, b2_ref, w3_ref, b3_ref,
               out_ref,
               c1_mem, c1_spk, h1_mem, h1_spk,
               h2_mem, h2_spk, h3_mem, h3_spk, h3_sum):
        # zero-init LIF state (single program, no pl.when needed)
        c1_mem[...] = jnp.zeros_like(c1_mem)
        c1_spk[...] = jnp.zeros_like(c1_spk)
        h1_mem[...] = jnp.zeros_like(h1_mem)
        h1_spk[...] = jnp.zeros_like(h1_spk)
        h2_mem[...] = jnp.zeros_like(h2_mem)
        h2_spk[...] = jnp.zeros_like(h2_spk)
        h3_mem[...] = jnp.zeros_like(h3_mem)
        h3_spk[...] = jnp.zeros_like(h3_spk)
        h3_sum[...] = jnp.zeros_like(h3_sum)

        # small loop-invariant biases hoisted out of the loop (few vregs)
        bconv = bconv_ref[...]
        b1 = b1_ref[...]
        b2 = b2_ref[...]
        b3 = b3_ref[...]

        def step(t, carry):
            x_t = x_ref[t]                                    # (1, XIN_PAD) f32

            # --- TAGConv folded into one matmul, output already flattened ---
            conv_t = jnp.dot(x_t, wconv_ref[...],
                             preferred_element_type=jnp.float32) + bconv

            # --- conv-layer LIF (mem_update_conv) ---
            c1m = c1_mem[...] * DECAY * (1.0 - c1_spk[...]) + conv_t
            c1s = (c1m > THRESH).astype(jnp.float32)
            c1_mem[...] = c1m
            c1_spk[...] = c1s

            # --- fc1: (1,2560)@(2560,128), bf16 MXU, f32 acc ---
            h1_in = jnp.dot(c1s.astype(jnp.bfloat16), w1_ref[...],
                            preferred_element_type=jnp.float32) + b1
            h1m = h1_mem[...] * DECAY * (1.0 - h1_spk[...]) + h1_in
            h1s = (h1m > THRESH).astype(jnp.float32)
            h1_mem[...] = h1m
            h1_spk[...] = h1s
            # (h1/h2 sumspike exist in the reference but are never used)

            # --- fc2 ---
            h2_in = jnp.dot(h1s.astype(jnp.bfloat16), w2_ref[...],
                            preferred_element_type=jnp.float32) + b2
            h2m = h2_mem[...] * DECAY * (1.0 - h2_spk[...]) + h2_in
            h2s = (h2m > THRESH).astype(jnp.float32)
            h2_mem[...] = h2m
            h2_spk[...] = h2s

            # --- fc3 (padded to 128 lanes; padded lanes stay exactly 0) ---
            h3_in = jnp.dot(h2s.astype(jnp.bfloat16), w3_ref[...],
                            preferred_element_type=jnp.float32) + b3
            h3m = h3_mem[...] * DECAY * (1.0 - h3_spk[...]) + h3_in
            h3s = (h3m > THRESH).astype(jnp.float32)
            h3_mem[...] = h3m
            h3_spk[...] = h3s
            h3_sum[...] = h3_sum[...] + h3s
            return carry

        jax.lax.fori_loop(0, T, step, 0)

        out_ref[...] = h3_sum[...] * inv_T

    return kernel


# ---------------------------------------------------------------------------
# Wrapper
# ---------------------------------------------------------------------------
def tactile_sgnet_forward(x_ncT, a_norm, params):
    """x_ncT: (N_TAXELS, C_IN, T) float32, like the PyTorch input."""
    N, C, T = x_ncT.shape
    assert N == N_TAXELS and C == C_IN
    wc, bc, w1, b1, w2, b2, w3, b3 = params

    # per-timestep input flattened node-major (n*2 + ci), lane-padded to 128
    xs = jnp.transpose(x_ncT, (2, 0, 1)).reshape(T, 1, XIN).astype(jnp.float32)
    xs = jnp.pad(xs, ((0, 0), (0, 0), (0, XIN_PAD - XIN)))       # (T, 1, 128)

    # Fold static graph + TAGConv weights into one matrix (trace-time, tiny):
    #   conv_flat[t] = x_flat[t] @ W_conv + b_conv
    #   W_conv[m*2+ci, n*64+c] = sum_k A^k[n,m] * Wk[ci,c]   (A^0 = I)
    eye = jnp.eye(N_TAXELS, dtype=jnp.float32)
    a1 = a_norm.astype(jnp.float32)
    a2 = a1 @ a1
    a3 = a2 @ a1
    apows = jnp.stack([eye, a1, a2, a3], axis=0)                 # (K+1, N, N)
    w_conv = jnp.einsum('knm,kic->minc', apows, wc).reshape(XIN, FC1_IN)
    w_conv = jnp.pad(w_conv, ((0, XIN_PAD - XIN), (0, FC1_PAD - FC1_IN)))
    b_conv = jnp.tile(bc, (1, N_TAXELS))                         # (1, 2496)
    b_conv = jnp.pad(b_conv, ((0, 0), (0, FC1_PAD - FC1_IN)))    # (1, 2560)

    # fc weights in bf16 for the MXU (spikes are exact 0/1 in bf16);
    # fc1 rows padded to 2560, fc3 head padded to 128 lanes (zeros)
    w1_p = jnp.pad(w1, ((0, FC1_PAD - FC1_IN), (0, 0))).astype(jnp.bfloat16)
    w2_b = w2.astype(jnp.bfloat16)
    w3_p = jnp.pad(w3, ((0, 0), (0, H3_PAD - NUM_CLASSES))).astype(jnp.bfloat16)
    b3_p = jnp.pad(b3, ((0, 0), (0, H3_PAD - NUM_CLASSES)))

    kernel = _make_fused_kernel(T)
    out_pad = pl.pallas_call(
        kernel,
        out_shape=jax.ShapeDtypeStruct((1, H3_PAD), jnp.float32),
        grid_spec=pltpu.PrefetchScalarGridSpec(
            num_scalar_prefetch=0,
            grid=(1,),
            in_specs=[
                pl.BlockSpec((T, 1, XIN_PAD), lambda i: (0, 0, 0)),   # x seq
                pl.BlockSpec((XIN_PAD, FC1_PAD), lambda i: (0, 0)),   # W_conv
                pl.BlockSpec((1, FC1_PAD), lambda i: (0, 0)),         # b_conv
                pl.BlockSpec((FC1_PAD, H1), lambda i: (0, 0)),        # fc1 W
                pl.BlockSpec((1, H1), lambda i: (0, 0)),              # fc1 b
                pl.BlockSpec((H1, H2), lambda i: (0, 0)),             # fc2 W
                pl.BlockSpec((1, H2), lambda i: (0, 0)),              # fc2 b
                pl.BlockSpec((H2, H3_PAD), lambda i: (0, 0)),         # fc3 W
                pl.BlockSpec((1, H3_PAD), lambda i: (0, 0)),          # fc3 b
            ],
            out_specs=pl.BlockSpec((1, H3_PAD), lambda i: (0, 0)),
            scratch_shapes=[
                pltpu.VMEM((1, FC1_PAD), jnp.float32),   # c1_mem
                pltpu.VMEM((1, FC1_PAD), jnp.float32),   # c1_spike
                pltpu.VMEM((1, H1), jnp.float32),        # h1_mem
                pltpu.VMEM((1, H1), jnp.float32),        # h1_spike
                pltpu.VMEM((1, H2), jnp.float32),        # h2_mem
                pltpu.VMEM((1, H2), jnp.float32),        # h2_spike
                pltpu.VMEM((1, H3_PAD), jnp.float32),    # h3_mem
                pltpu.VMEM((1, H3_PAD), jnp.float32),    # h3_spike
                pltpu.VMEM((1, H3_PAD), jnp.float32),    # h3_sumspike
            ],
        ),
        compiler_params=pltpu.CompilerParams(
            dimension_semantics=("arbitrary",)),         # recurrent over time
    )(xs, w_conv, b_conv, w1_p, b1, w2_b, b2, w3_p, b3_p)

    return out_pad[0, :NUM_CLASSES]                      # (NUM_CLASSES,)


def build_normalized_adjacency(n=N_TAXELS):
    # TODO(synk): TactileGraph topology not provided; deterministic ring+skip graph.
    A = np.zeros((n, n), np.float32)
    for i in range(n):
        for d in (1, 2):
            j = (i + d) % n
            A[i, j] = 1.0
            A[j, i] = 1.0
    deg = A.sum(axis=1)
    dinv = 1.0 / np.sqrt(np.maximum(deg, 1.0))
    return jnp.asarray(A * dinv[:, None] * dinv[None, :], jnp.float32)


def init_params(key):
    ks = jax.random.split(key, 8)
    wc = jax.random.normal(ks[0], (K_HOPS + 1, C_IN, C_OUT), jnp.float32) / np.sqrt(C_IN)
    bc = 0.1 * jax.random.normal(ks[1], (1, C_OUT), jnp.float32)
    # dense weights stored input-major (in, out) == torch weight.T
    w1 = jax.random.normal(ks[2], (FC1_IN, H1), jnp.float32) / np.sqrt(FC1_IN)
    b1 = 0.1 * jax.random.normal(ks[3], (1, H1), jnp.float32)
    w2 = jax.random.normal(ks[4], (H1, H2), jnp.float32) / np.sqrt(H1)
    b2 = 0.1 * jax.random.normal(ks[5], (1, H2), jnp.float32)
    w3 = jax.random.normal(ks[6], (H2, NUM_CLASSES), jnp.float32) / np.sqrt(H2)
    b3 = 0.1 * jax.random.normal(ks[7], (1, NUM_CLASSES), jnp.float32)
    return (wc, bc, w1, b1, w2, b2, w3, b3)


if __name__ == "__main__":
    key = jax.random.PRNGKey(0)
    k_in, k_par = jax.random.split(key)

    T = 8  # small time window
    x = jax.random.uniform(k_in, (N_TAXELS, C_IN, T), jnp.float32, 0.0, 2.0)

    a_norm = build_normalized_adjacency()
    params = init_params(k_par)

    forward = jax.jit(tactile_sgnet_forward)
    out = forward(x, a_norm, params)
    jax.block_until_ready(out)
    assert out.shape == (NUM_CLASSES,)
    print("KERNEL_OK")
</pallas_src>

<mosaic_0001>
module attributes {stable_mosaic.version = 11 : i64} {
  func.func @kernel(%arg0: i32, %arg1: memref<8x1x128xf32, #tpu.memory_space<vmem>>, %arg2: memref<128x2560xf32, #tpu.memory_space<vmem>>, %arg3: memref<1x2560xf32, #tpu.memory_space<vmem>>, %arg4: memref<2560x128xbf16, #tpu.memory_space<vmem>>, %arg5: memref<1x128xf32, #tpu.memory_space<vmem>>, %arg6: memref<128x256xbf16, #tpu.memory_space<vmem>>, %arg7: memref<1x256xf32, #tpu.memory_space<vmem>>, %arg8: memref<256x128xbf16, #tpu.memory_space<vmem>>, %arg9: memref<1x128xf32, #tpu.memory_space<vmem>>, %arg10: memref<1x128xf32, #tpu.memory_space<vmem>>, %arg11: memref<1x2560xf32, #tpu.memory_space<vmem>>, %arg12: memref<1x2560xf32, #tpu.memory_space<vmem>>, %arg13: memref<1x128xf32, #tpu.memory_space<vmem>>, %arg14: memref<1x128xf32, #tpu.memory_space<vmem>>, %arg15: memref<1x256xf32, #tpu.memory_space<vmem>>, %arg16: memref<1x256xf32, #tpu.memory_space<vmem>>, %arg17: memref<1x128xf32, #tpu.memory_space<vmem>>, %arg18: memref<1x128xf32, #tpu.memory_space<vmem>>, %arg19: memref<1x128xf32, #tpu.memory_space<vmem>>) attributes {dimension_semantics = [#tpu.dimension_semantics<arbitrary>], iteration_bounds = array<i64: 1>, scalar_prefetch = 0 : i64, scratch_operands = 9 : i64, tpu.core_type = #tpu.core_type<tc>, window_params = [{pipeline_mode = #tpu.pipeline_mode<synchronous>, transform_indices = @transform_0, window_bounds = array<i64: 8, 1, 128>}, {pipeline_mode = #tpu.pipeline_mode<synchronous>, transform_indices = @transform_1, window_bounds = array<i64: 128, 2560>}, {pipeline_mode = #tpu.pipeline_mode<synchronous>, transform_indices = @transform_2, window_bounds = array<i64: 1, 2560>}, {pipeline_mode = #tpu.pipeline_mode<synchronous>, transform_indices = @transform_3, window_bounds = array<i64: 2560, 128>}, {pipeline_mode = #tpu.pipeline_mode<synchronous>, transform_indices = @transform_4, window_bounds = array<i64: 1, 128>}, {pipeline_mode = #tpu.pipeline_mode<synchronous>, transform_indices = @transform_5, window_bounds = array<i64: 128, 256>}, {pipeline_mode = #tpu.pipeline_mode<synchronous>, transform_indices = @transform_6, window_bounds = array<i64: 1, 256>}, {pipeline_mode = #tpu.pipeline_mode<synchronous>, transform_indices = @transform_7, window_bounds = array<i64: 256, 128>}, {pipeline_mode = #tpu.pipeline_mode<synchronous>, transform_indices = @transform_8, window_bounds = array<i64: 1, 128>}, {pipeline_mode = #tpu.pipeline_mode<synchronous>, transform_indices = @transform_9, window_bounds = array<i64: 1, 128>}]} {
    %cst = arith.constant 0.000000e+00 : f32
    %0 = vector.broadcast %cst : f32 to vector<1x2560xf32>
    %c0 = arith.constant 0 : index
    %c0_0 = arith.constant 0 : index
    %1 = vector.load %arg11[%c0, %c0_0] : memref<1x2560xf32, #tpu.memory_space<vmem>>, vector<1x2560xf32>
    tpu.vector_store %arg11[%c0, %c0_0], %0 {strides = array<i32>} : memref<1x2560xf32, #tpu.memory_space<vmem>>, vector<1x2560xf32>,
    %cst_1 = arith.constant 0.000000e+00 : f32
    %2 = vector.broadcast %cst_1 : f32 to vector<1x2560xf32>
    %c0_2 = arith.constant 0 : index
    %c0_3 = arith.constant 0 : index
    %3 = vector.load %arg12[%c0_2, %c0_3] : memref<1x2560xf32, #tpu.memory_space<vmem>>, vector<1x2560xf32>
    tpu.vector_store %arg12[%c0_2, %c0_3], %2 {strides = array<i32>} : memref<1x2560xf32, #tpu.memory_space<vmem>>, vector<1x2560xf32>,
    %cst_4 = arith.constant 0.000000e+00 : f32
    %4 = vector.broadcast %cst_4 : f32 to vector<1x128xf32>
    %c0_5 = arith.constant 0 : index
    %c0_6 = arith.constant 0 : index
    %5 = vector.load %arg13[%c0_5, %c0_6] : memref<1x128xf32, #tpu.memory_space<vmem>>, vector<1x128xf32>
    tpu.vector_store %arg13[%c0_5, %c0_6], %4 {strides = array<i32>} : memref<1x128xf32, #tpu.memory_space<vmem>>, vector<1x128xf32>,
    %cst_7 = arith.constant 0.000000e+00 : f32
    %6 = vector.broadcast %cst_7 : f32 to vector<1x128xf32>
    %c0_8 = arith.constant 0 : index
    %c0_9 = arith.constant 0 : index
    %7 = vector.load %arg14[%c0_8, %c0_9] : memref<1x128xf32, #tpu.memory_space<vmem>>, vector<1x128xf32>
    tpu.vector_store %arg14[%c0_8, %c0_9], %6 {strides = array<i32>} : memref<1x128xf32, #tpu.memory_space<vmem>>, vector<1x128xf32>,
    %cst_10 = arith.constant 0.000000e+00 : f32
    %8 = vector.broadcast %cst_10 : f32 to vector<1x256xf32>
    %c0_11 = arith.constant 0 : index
    %c0_12 = arith.constant 0 : index
    %9 = vector.load %arg15[%c0_11, %c0_12] : memref<1x256xf32, #tpu.memory_space<vmem>>, vector<1x256xf32>
    tpu.vector_store %arg15[%c0_11, %c0_12], %8 {strides = array<i32>} : memref<1x256xf32, #tpu.memory_space<vmem>>, vector<1x256xf32>,
    %cst_13 = arith.constant 0.000000e+00 : f32
    %10 = vector.broadcast %cst_13 : f32 to vector<1x256xf32>
    %c0_14 = arith.constant 0 : index
    %c0_15 = arith.constant 0 : index
    %11 = vector.load %arg16[%c0_14, %c0_15] : memref<1x256xf32, #tpu.memory_space<vmem>>, vector<1x256xf32>
    tpu.vector_store %arg16[%c0_14, %c0_15], %10 {strides = array<i32>} : memref<1x256xf32, #tpu.memory_space<vmem>>, vector<1x256xf32>,
    %cst_16 = arith.constant 0.000000e+00 : f32
    %12 = vector.broadcast %cst_16 : f32 to vector<1x128xf32>
    %c0_17 = arith.constant 0 : index
    %c0_18 = arith.constant 0 : index
    %13 = vector.load %arg17[%c0_17, %c0_18] : memref<1x128xf32, #tpu.memory_space<vmem>>, vector<1x128xf32>
    tpu.vector_store %arg17[%c0_17, %c0_18], %12 {strides = array<i32>} : memref<1x128xf32, #tpu.memory_space<vmem>>, vector<1x128xf32>,
    %cst_19 = arith.constant 0.000000e+00 : f32
    %14 = vector.broadcast %cst_19 : f32 to vector<1x128xf32>
    %c0_20 = arith.constant 0 : index
    %c0_21 = arith.constant 0 : index
    %15 = vector.load %arg18[%c0_20, %c0_21] : memref<1x128xf32, #tpu.memory_space<vmem>>, vector<1x128xf32>
    tpu.vector_store %arg18[%c0_20, %c0_21], %14 {strides = array<i32>} : memref<1x128xf32, #tpu.memory_space<vmem>>, vector<1x128xf32>,
    %cst_22 = arith.constant 0.000000e+00 : f32
    %16 = vector.broadcast %cst_22 : f32 to vector<1x128xf32>
    %c0_23 = arith.constant 0 : index
    %c0_24 = arith.constant 0 : index
    %17 = vector.load %arg19[%c0_23, %c0_24] : memref<1x128xf32, #tpu.memory_space<vmem>>, vector<1x128xf32>
    tpu.vector_store %arg19[%c0_23, %c0_24], %16 {strides = array<i32>} : memref<1x128xf32, #tpu.memory_space<vmem>>, vector<1x128xf32>,
    %c0_25 = arith.constant 0 : index
    %c0_26 = arith.constant 0 : index
    %18 = vector.load %arg3[%c0_25, %c0_26] : memref<1x2560xf32, #tpu.memory_space<vmem>>, vector<1x2560xf32>
    %c0_27 = arith.constant 0 : index
    %c0_28 = arith.constant 0 : index
    %19 = vector.load %arg5[%c0_27, %c0_28] : memref<1x128xf32, #tpu.memory_space<vmem>>, vector<1x128xf32>
    %c0_29 = arith.constant 0 : index
    %c0_30 = arith.constant 0 : index
    %20 = vector.load %arg7[%c0_29, %c0_30] : memref<1x256xf32, #tpu.memory_space<vmem>>, vector<1x256xf32>
    %c0_31 = arith.constant 0 : index
    %c0_32 = arith.constant 0 : index
    %21 = vector.load %arg9[%c0_31, %c0_32] : memref<1x128xf32, #tpu.memory_space<vmem>>, vector<1x128xf32>
    %c0_i32 = arith.constant 0 : i32
    %c8_i32 = arith.constant 8 : i32
    %22 = arith.addi %c0_i32, %c8_i32 : i32
    %c1_i32 = arith.constant 1 : i32
    scf.for %arg20 = %c0_i32 to %22 step %c1_i32  : i32 {
      %27 = arith.index_cast %arg20 : i32 to index
      %c0_39 = arith.constant 0 : index
      %c0_40 = arith.constant 0 : index
      %28 = vector.load %arg1[%27, %c0_39, %c0_40] : memref<8x1x128xf32, #tpu.memory_space<vmem>>, vector<1x1x128xf32>
      %29 = vector.shape_cast %28 : vector<1x1x128xf32> to vector<1x128xf32>
      %c0_41 = arith.constant 0 : index
      %c0_42 = arith.constant 0 : index
      %30 = vector.load %arg2[%c0_41, %c0_42] : memref<128x2560xf32, #tpu.memory_space<vmem>>, vector<128x2560xf32>
      %cst_43 = arith.constant dense<0.000000e+00> : vector<1x2560xf32>
      %31 = tpu.matmul %29, %30, %cst_43 {dimension_numbers = #tpu.dot_dimension_numbers<[1], [0], [0], [1], [0, 0, 1, 1], [], []>} : vector<1x128xf32>, vector<128x2560xf32>, vector<1x2560xf32> -> vector<1x2560xf32>
      %32 = arith.addf %31, %18 : vector<1x2560xf32>
      %c0_44 = arith.constant 0 : index
      %c0_45 = arith.constant 0 : index
      %33 = vector.load %arg11[%c0_44, %c0_45] : memref<1x2560xf32, #tpu.memory_space<vmem>>, vector<1x2560xf32>
      %cst_46 = arith.constant 2.000000e-01 : f32
      %34 = vector.broadcast %cst_46 : f32 to vector<1x2560xf32>
      %35 = arith.mulf %33, %34 : vector<1x2560xf32>
      %c0_47 = arith.constant 0 : index
      %c0_48 = arith.constant 0 : index
      %36 = vector.load %arg12[%c0_47, %c0_48] : memref<1x2560xf32, #tpu.memory_space<vmem>>, vector<1x2560xf32>
      %cst_49 = arith.constant 1.000000e+00 : f32
      %37 = vector.broadcast %cst_49 : f32 to vector<1x2560xf32>
      %38 = arith.subf %37, %36 : vector<1x2560xf32>
      %39 = arith.mulf %35, %38 : vector<1x2560xf32>
      %40 = arith.addf %39, %32 : vector<1x2560xf32>
      %cst_50 = arith.constant 5.000000e-01 : f32
      %41 = vector.broadcast %cst_50 : f32 to vector<1x2560xf32>
      %42 = arith.cmpf ogt, %40, %41 : vector<1x2560xf32>
      %43 = arith.extui %42 : vector<1x2560xi1> to vector<1x2560xi32>
      %44 = arith.sitofp %43 : vector<1x2560xi32> to vector<1x2560xf32>
      %c0_51 = arith.constant 0 : index
      %c0_52 = arith.constant 0 : index
      %45 = vector.load %arg11[%c0_51, %c0_52] : memref<1x2560xf32, #tpu.memory_space<vmem>>, vector<1x2560xf32>
      tpu.vector_store %arg11[%c0_51, %c0_52], %40 {strides = array<i32>} : memref<1x2560xf32, #tpu.memory_space<vmem>>, vector<1x2560xf32>,
      %c0_53 = arith.constant 0 : index
      %c0_54 = arith.constant 0 : index
      %46 = vector.load %arg12[%c0_53, %c0_54] : memref<1x2560xf32, #tpu.memory_space<vmem>>, vector<1x2560xf32>
      tpu.vector_store %arg12[%c0_53, %c0_54], %44 {strides = array<i32>} : memref<1x2560xf32, #tpu.memory_space<vmem>>, vector<1x2560xf32>,
      %47 = arith.truncf %44 : vector<1x2560xf32> to vector<1x2560xbf16>
      %c0_55 = arith.constant 0 : index
      %c0_56 = arith.constant 0 : index
      %48 = vector.load %arg4[%c0_55, %c0_56] : memref<2560x128xbf16, #tpu.memory_space<vmem>>, vector<2560x128xbf16>
      %cst_57 = arith.constant dense<0.000000e+00> : vector<1x128xf32>
      %49 = tpu.matmul %47, %48, %cst_57 {dimension_numbers = #tpu.dot_dimension_numbers<[1], [0], [0], [1], [0, 0, 1, 1], [], []>} : vector<1x2560xbf16>, vector<2560x128xbf16>, vector<1x128xf32> -> vector<1x128xf32>
      %50 = arith.addf %49, %19 : vector<1x128xf32>
      %c0_58 = arith.constant 0 : index
      %c0_59 = arith.constant 0 : index
      %51 = vector.load %arg13[%c0_58, %c0_59] : memref<1x128xf32, #tpu.memory_space<vmem>>, vector<1x128xf32>
      %cst_60 = arith.constant 2.000000e-01 : f32
      %52 = vector.broadcast %cst_60 : f32 to vector<1x128xf32>
      %53 = arith.mulf %51, %52 : vector<1x128xf32>
      %c0_61 = arith.constant 0 : index
      %c0_62 = arith.constant 0 : index
      %54 = vector.load %arg14[%c0_61, %c0_62] : memref<1x128xf32, #tpu.memory_space<vmem>>, vector<1x128xf32>
      %cst_63 = arith.constant 1.000000e+00 : f32
      %55 = vector.broadcast %cst_63 : f32 to vector<1x128xf32>
      %56 = arith.subf %55, %54 : vector<1x128xf32>
      %57 = arith.mulf %53, %56 : vector<1x128xf32>
      %58 = arith.addf %57, %50 : vector<1x128xf32>
      %cst_64 = arith.constant 5.000000e-01 : f32
      %59 = vector.broadcast %cst_64 : f32 to vector<1x128xf32>
      %60 = arith.cmpf ogt, %58, %59 : vector<1x128xf32>
      %61 = arith.extui %60 : vector<1x128xi1> to vector<1x128xi32>
      %62 = arith.sitofp %61 : vector<1x128xi32> to vector<1x128xf32>
      %c0_65 = arith.constant 0 : index
      %c0_66 = arith.constant 0 : index
      %63 = vector.load %arg13[%c0_65, %c0_66] : memref<1x128xf32, #tpu.memory_space<vmem>>, vector<1x128xf32>
      tpu.vector_store %arg13[%c0_65, %c0_66], %58 {strides = array<i32>} : memref<1x128xf32, #tpu.memory_space<vmem>>, vector<1x128xf32>,
      %c0_67 = arith.constant 0 : index
      %c0_68 = arith.constant 0 : index
      %64 = vector.load %arg14[%c0_67, %c0_68] : memref<1x128xf32, #tpu.memory_space<vmem>>, vector<1x128xf32>
      tpu.vector_store %arg14[%c0_67, %c0_68], %62 {strides = array<i32>} : memref<1x128xf32, #tpu.memory_space<vmem>>, vector<1x128xf32>,
      %65 = arith.truncf %62 : vector<1x128xf32> to vector<1x128xbf16>
      %c0_69 = arith.constant 0 : index
      %c0_70 = arith.constant 0 : index
      %66 = vector.load %arg6[%c0_69, %c0_70] : memref<128x256xbf16, #tpu.memory_space<vmem>>, vector<128x256xbf16>
      %cst_71 = arith.constant dense<0.000000e+00> : vector<1x256xf32>
      %67 = tpu.matmul %65, %66, %cst_71 {dimension_numbers = #tpu.dot_dimension_numbers<[1], [0], [0], [1], [0, 0, 1, 1], [], []>} : vector<1x128xbf16>, vector<128x256xbf16>, vector<1x256xf32> -> vector<1x256xf32>
      %68 = arith.addf %67, %20 : vector<1x256xf32>
      %c0_72 = arith.constant 0 : index
      %c0_73 = arith.constant 0 : index
      %69 = vector.load %arg15[%c0_72, %c0_73] : memref<1x256xf32, #tpu.memory_space<vmem>>, vector<1x256xf32>
      %cst_74 = arith.constant 2.000000e-01 : f32
      %70 = vector.broadcast %cst_74 : f32 to vector<1x256xf32>
      %71 = arith.mulf %69, %70 : vector<1x256xf32>
      %c0_75 = arith.constant 0 : index
      %c0_76 = arith.constant 0 : index
      %72 = vector.load %arg16[%c0_75, %c0_76] : memref<1x256xf32, #tpu.memory_space<vmem>>, vector<1x256xf32>
      %cst_77 = arith.constant 1.000000e+00 : f32
      %73 = vector.broadcast %cst_77 : f32 to vector<1x256xf32>
      %74 = arith.subf %73, %72 : vector<1x256xf32>
      %75 = arith.mulf %71, %74 : vector<1x256xf32>
      %76 = arith.addf %75, %68 : vector<1x256xf32>
      %cst_78 = arith.constant 5.000000e-01 : f32
      %77 = vector.broadcast %cst_78 : f32 to vector<1x256xf32>
      %78 = arith.cmpf ogt, %76, %77 : vector<1x256xf32>
      %79 = arith.extui %78 : vector<1x256xi1> to vector<1x256xi32>
      %80 = arith.sitofp %79 : vector<1x256xi32> to vector<1x256xf32>
      %c0_79 = arith.constant 0 : index
      %c0_80 = arith.constant 0 : index
      %81 = vector.load %arg15[%c0_79, %c0_80] : memref<1x256xf32, #tpu.memory_space<vmem>>, vector<1x256xf32>
      tpu.vector_store %arg15[%c0_79, %c0_80], %76 {strides = array<i32>} : memref<1x256xf32, #tpu.memory_space<vmem>>, vector<1x256xf32>,
      %c0_81 = arith.constant 0 : index
      %c0_82 = arith.constant 0 : index
      %82 = vector.load %arg16[%c0_81, %c0_82] : memref<1x256xf32, #tpu.memory_space<vmem>>, vector<1x256xf32>
      tpu.vector_store %arg16[%c0_81, %c0_82], %80 {strides = array<i32>} : memref<1x256xf32, #tpu.memory_space<vmem>>, vector<1x256xf32>,
      %83 = arith.truncf %80 : vector<1x256xf32> to vector<1x256xbf16>
      %c0_83 = arith.constant 0 : index
      %c0_84 = arith.constant 0 : index
      %84 = vector.load %arg8[%c0_83, %c0_84] : memref<256x128xbf16, #tpu.memory_space<vmem>>, vector<256x128xbf16>
      %cst_85 = arith.constant dense<0.000000e+00> : vector<1x128xf32>
      %85 = tpu.matmul %83, %84, %cst_85 {dimension_numbers = #tpu.dot_dimension_numbers<[1], [0], [0], [1], [0, 0, 1, 1], [], []>} : vector<1x256xbf16>, vector<256x128xbf16>, vector<1x128xf32> -> vector<1x128xf32>
      %86 = arith.addf %85, %21 : vector<1x128xf32>
      %c0_86 = arith.constant 0 : index
      %c0_87 = arith.constant 0 : index
      %87 = vector.load %arg17[%c0_86, %c0_87] : memref<1x128xf32, #tpu.memory_space<vmem>>, vector<1x128xf32>
      %cst_88 = arith.constant 2.000000e-01 : f32
      %88 = vector.broadcast %cst_88 : f32 to vector<1x128xf32>
      %89 = arith.mulf %87, %88 : vector<1x128xf32>
      %c0_89 = arith.constant 0 : index
      %c0_90 = arith.constant 0 : index
      %90 = vector.load %arg18[%c0_89, %c0_90] : memref<1x128xf32, #tpu.memory_space<vmem>>, vector<1x128xf32>
      %cst_91 = arith.constant 1.000000e+00 : f32
      %91 = vector.broadcast %cst_91 : f32 to vector<1x128xf32>
      %92 = arith.subf %91, %90 : vector<1x128xf32>
      %93 = arith.mulf %89, %92 : vector<1x128xf32>
      %94 = arith.addf %93, %86 : vector<1x128xf32>
      %cst_92 = arith.constant 5.000000e-01 : f32
      %95 = vector.broadcast %cst_92 : f32 to vector<1x128xf32>
      %96 = arith.cmpf ogt, %94, %95 : vector<1x128xf32>
      %97 = arith.extui %96 : vector<1x128xi1> to vector<1x128xi32>
      %98 = arith.sitofp %97 : vector<1x128xi32> to vector<1x128xf32>
      %c0_93 = arith.constant 0 : index
      %c0_94 = arith.constant 0 : index
      %99 = vector.load %arg17[%c0_93, %c0_94] : memref<1x128xf32, #tpu.memory_space<vmem>>, vector<1x128xf32>
      tpu.vector_store %arg17[%c0_93, %c0_94], %94 {strides = array<i32>} : memref<1x128xf32, #tpu.memory_space<vmem>>, vector<1x128xf32>,
      %c0_95 = arith.constant 0 : index
      %c0_96 = arith.constant 0 : index
      %100 = vector.load %arg18[%c0_95, %c0_96] : memref<1x128xf32, #tpu.memory_space<vmem>>, vector<1x128xf32>
      tpu.vector_store %arg18[%c0_95, %c0_96], %98 {strides = array<i32>} : memref<1x128xf32, #tpu.memory_space<vmem>>, vector<1x128xf32>,
      %c0_97 = arith.constant 0 : index
      %c0_98 = arith.constant 0 : index
      %101 = vector.load %arg19[%c0_97, %c0_98] : memref<1x128xf32, #tpu.memory_space<vmem>>, vector<1x128xf32>
      %102 = arith.addf %101, %98 : vector<1x128xf32>
      %c0_99 = arith.constant 0 : index
      %c0_100 = arith.constant 0 : index
      %103 = vector.load %arg19[%c0_99, %c0_100] : memref<1x128xf32, #tpu.memory_space<vmem>>, vector<1x128xf32>
      tpu.vector_store %arg19[%c0_99, %c0_100], %102 {strides = array<i32>} : memref<1x128xf32, #tpu.memory_space<vmem>>, vector<1x128xf32>,
    }
    %c8_i32_33 = arith.constant 8 : i32
    %c0_34 = arith.constant 0 : index
    %c0_35 = arith.constant 0 : index
    %23 = vector.load %arg19[%c0_34, %c0_35] : memref<1x128xf32, #tpu.memory_space<vmem>>, vector<1x128xf32>
    %cst_36 = arith.constant 1.250000e-01 : f32
    %24 = vector.broadcast %cst_36 : f32 to vector<1x128xf32>
    %25 = arith.mulf %23, %24 : vector<1x128xf32>
    %c0_37 = arith.constant 0 : index
    %c0_38 = arith.constant 0 : index
    %26 = vector.load %arg10[%c0_37, %c0_38] : memref<1x128xf32, #tpu.memory_space<vmem>>, vector<1x128xf32>
    tpu.vector_store %arg10[%c0_37, %c0_38], %25 {strides = array<i32>} : memref<1x128xf32, #tpu.memory_space<vmem>>, vector<1x128xf32>,
    return
  }
  func.func @transform_0(%arg0: i32) -> (i32, i32, i32) {
    %c0_i32 = arith.constant 0 : i32
    %c0_i32_0 = arith.constant 0 : i32
    %c0_i32_1 = arith.constant 0 : i32
    %c0_i32_2 = arith.constant 0 : i32
    return %c0_i32, %c0_i32_0, %c0_i32_1 : i32, i32, i32
  }
  func.func @transform_1(%arg0: i32) -> (i32, i32) {
    %c0_i32 = arith.constant 0 : i32
    %c0_i32_0 = arith.constant 0 : i32
    %c0_i32_1 = arith.constant 0 : i32
    return %c0_i32, %c0_i32_0 : i32, i32
  }
  func.func @transform_2(%arg0: i32) -> (i32, i32) {
    %c0_i32 = arith.constant 0 : i32
    %c0_i32_0 = arith.constant 0 : i32
    %c0_i32_1 = arith.constant 0 : i32
    return %c0_i32, %c0_i32_0 : i32, i32
  }
  func.func @transform_3(%arg0: i32) -> (i32, i32) {
    %c0_i32 = arith.constant 0 : i32
    %c0_i32_0 = arith.constant 0 : i32
    %c0_i32_1 = arith.constant 0 : i32
    return %c0_i32, %c0_i32_0 : i32, i32
  }
  func.func @transform_4(%arg0: i32) -> (i32, i32) {
    %c0_i32 = arith.constant 0 : i32
    %c0_i32_0 = arith.constant 0 : i32
    %c0_i32_1 = arith.constant 0 : i32
    return %c0_i32, %c0_i32_0 : i32, i32
  }
  func.func @transform_5(%arg0: i32) -> (i32, i32) {
    %c0_i32 = arith.constant 0 : i32
    %c0_i32_0 = arith.constant 0 : i32
    %c0_i32_1 = arith.constant 0 : i32
    return %c0_i32, %c0_i32_0 : i32, i32
  }
  func.func @transform_6(%arg0: i32) -> (i32, i32) {
    %c0_i32 = arith.constant 0 : i32
    %c0_i32_0 = arith.constant 0 : i32
    %c0_i32_1 = arith.constant 0 : i32
    return %c0_i32, %c0_i32_0 : i32, i32
  }
  func.func @transform_7(%arg0: i32) -> (i32, i32) {
    %c0_i32 = arith.constant 0 : i32
    %c0_i32_0 = arith.constant 0 : i32
    %c0_i32_1 = arith.constant 0 : i32
    return %c0_i32, %c0_i32_0 : i32, i32
  }
  func.func @transform_8(%arg0: i32) -> (i32, i32) {
    %c0_i32 = arith.constant 0 : i32
    %c0_i32_0 = arith.constant 0 : i32
    %c0_i32_1 = arith.constant 0 : i32
    return %c0_i32, %c0_i32_0 : i32, i32
  }
  func.func @transform_9(%arg0: i32) -> (i32, i32) {
    %c0_i32 = arith.constant 0 : i32
    %c0_i32_0 = arith.constant 0 : i32
    %c0_i32_1 = arith.constant 0 : i32
    return %c0_i32, %c0_i32_0 : i32, i32
  }
}

</mosaic_0001>

<bundles_post_ra>
// kernel: tactile_sgnet_forward.1
= control target key start
LH: loop header
LB: loop body
LE: loop exit
PB: predicated region body
PF: predicated region fallthrough
CT: control target
= control target key end

     0   :  { %v35_v0 = vlaneseq  ;;  %v4561_v1 = vmov 0.0   ;;  %s6395_s0 = inlined_call_operand.vmem [shape: f32[8,1,128], index: 0, kind: input, shape index: {}]   ;;  %s6396_s1 = inlined_call_operand.vmem [shape: f32[128,2560], index: 1, kind: input, shape index: {}]   ;;  %s6397_s2 = inlined_call_operand.vmem [shape: f32[1,2560], index: 2, kind: input, shape index: {}]   ;;  %s6398_s3 = inlined_call_operand.vmem [shape: bf16[2560,128], index: 3, kind: input, shape index: {}]   ;;  %s6399_s4 = inlined_call_operand.vmem [shape: f32[1,128], index: 4, kind: input, shape index: {}]   ;;  %s6400_s5 = inlined_call_operand.vmem [shape: bf16[128,256], index: 5, kind: input, shape index: {}]   ;;  %s6401_s6 = inlined_call_operand.vmem [shape: f32[1,256], index: 6, kind: input, shape index: {}]   ;;  %s6402_s7 = inlined_call_operand.vmem [shape: bf16[256,128], index: 7, kind: input, shape index: {}]   ;;  %s6403_s8 = inlined_call_operand.vmem [shape: f32[1,128], index: 8, kind: input, shape index: {}]   ;;  %s6404_s9 = inlined_call_operand.vmem [shape: f32[1,128], index: 9, kind: output, shape index: {}]  }
   0x1   :  { %33 = vst [vmem:[#allocation2] sm:$0xff] %v4561_v1  ;;  %34 = vst [vmem:[#allocation2 + $0x8] sm:$0xff] %v4561_v1  ;;  %v4619_v2 = vld [vmem:[%s6397_s2] sm:$0xff]  ;;  %v4624_v3 = vld [vmem:[%s6397_s2 + $0x8] sm:$0xff] }
   0x2   :  { %40 = vst [vmem:[#allocation3] sm:$0xff] %v4561_v1  ;;  %41 = vst [vmem:[#allocation3 + $0x8] sm:$0xff] %v4561_v1  ;;  %v4629_v4 = vld [vmem:[%s6397_s2 + $0x10] sm:$0xf]  ;;  %v4634_v5 = vld [vmem:[%s6399_s4] sm:$0x1] }
   0x3   :  { %43 = vst [vmem:[#allocation4] sm:$0x1] %v4561_v1  ;;  %44 = vst [vmem:[#allocation5] sm:$0x1] %v4561_v1  ;;  %v4639_v6 = vld [vmem:[%s6401_s6] sm:$0x3] }
   0x4   :  { %49 = vst [vmem:[#allocation8] sm:$0x1] %v4561_v1  ;;  %50 = vst [vmem:[#allocation9] sm:$0x1] %v4561_v1  ;;  %v4644_v7 = vld [vmem:[%s6403_s8] sm:$0x1] }
   0x5   :  { %51 = vst [vmem:[#allocation10] sm:$0x1] %v4561_v1  ;;  %vm4647_vm0 = vcmp.lt.s32.totalorder %v35_v0, 512  ;;  %vm4652_vm1 = vcmp.lt.s32.totalorder %v35_v0, 256  ;;  %s4664_s2 = smov 0  }
   0x6   :  { %39 = vst.msk [vmem:[#allocation2 + $0x10] sm:$0xf] %vm4647_vm0, %v4561_v1  ;;  %42 = vst.msk [vmem:[#allocation3 + $0x10] sm:$0xf] %vm4647_vm0, %v4561_v1 }
   0x7   :  { %47 = vst.msk [vmem:[#allocation6] sm:$0x3] %vm4652_vm1, %v4561_v1  ;;  %48 = vst.msk [vmem:[#allocation7] sm:$0x3] %vm4652_vm1, %v4561_v1 }
   0x8 LB: > { %v67_v10 = vld [vmem:[%s6396_s1 + $0x8] sm:$0xff]  ;;  %v69_v12 = vld [vmem:[%s6396_s1 + $0x18] sm:$0xff]  ;;  %v66_v15 = vld [vmem:[%s6396_s1] sm:$0xff]  ;;  %v4562_v17 = vmov 0.0   ;;  %s4879_s15 = scalar_lea.vmem %s6395_s0, %s4559_s2  ;;  %s63_s2 = sadd.s32 1, %s4559_s2   ;;  %s4559_s2 = sphi %s4664_s2, %s63_s2  }
   0x9   : > { %v87_v11 = vld [vmem:[%s6396_s1 + $0xa8] sm:$0xff]  ;;  %v89_v14 = vld [vmem:[%s6396_s1 + $0xb8] sm:$0xff]  ;;  %v86_v16 = vld [vmem:[%s6396_s1 + $0xa0] sm:$0xff]  ;;  %553 = vmatprep.mubr.f32.mxu0 %v4562_v17  ;;  %624 = vmatprep.mubr.f32.mxu1 %v4562_v17  ;;  %p60_p0 = scmp.ge.s32.totalorder %s63_s2, 8  }
   0xa   : > { %v4019_v13 = vpack.c.bf16 %v87_v11, %v67_v10  ;;  %v4051_v18 = vpack.c.bf16 %v89_v14, %v69_v12  ;;  %v4021_v19 = vpack.c.bf16 %v86_v16, %v66_v15  ;;  %v68_v20 = vld [vmem:[%s6396_s1 + $0x10] sm:$0xff]  ;;  %v107_v22 = vld [vmem:[%s6396_s1 + $0x148] sm:$0xff]  ;;  %v109_v25 = vld [vmem:[%s6396_s1 + $0x158] sm:$0xff] }
   0xb   : > { %v88_v21 = vld [vmem:[%s6396_s1 + $0xb0] sm:$0xff]  ;;  %v127_v24 = vld [vmem:[%s6396_s1 + $0x1e8] sm:$0xff]  ;;  %v129_v26 = vld [vmem:[%s6396_s1 + $0x1f8] sm:$0xff] }
   0xc   : > { %4020 = vmatprep.subr.bf16.mxu0 %v4019_v13  ;;  %v4053_v23 = vpack.c.bf16 %v88_v21, %v68_v20  ;;  %4052 = vmatprep.subr.bf16.mxu1 %v4051_v18  ;;  %v4023_v27 = vpack.c.bf16 %v127_v24, %v107_v22  ;;  %v4055_v28 = vpack.c.bf16 %v129_v26, %v109_v25  ;;  %v106_v29 = vld [vmem:[%s6396_s1 + $0x140] sm:$0xff]  ;;  %v108_v31 = vld [vmem:[%s6396_s1 + $0x150] sm:$0xff]  ;;  %v147_v34 = vld [vmem:[%s6396_s1 + $0x288] sm:$0xff] }
   0xd   : > { %4022 = vmatpush1.bf16.msra.mxu0 %v4021_v19  ;;  %v126_v30 = vld [vmem:[%s6396_s1 + $0x1e0] sm:$0xff]  ;;  %v128_v33 = vld [vmem:[%s6396_s1 + $0x1f0] sm:$0xff]  ;;  %v167_v35 = vld [vmem:[%s6396_s1 + $0x328] sm:$0xff] }
   0xe   : > { %4054 = vmatpush1.bf16.msra.mxu1 %v4053_v23  ;;  %v4025_v32 = vpack.c.bf16 %v126_v30, %v106_v29  ;;  %4024 = vmatprep.subr.bf16.mxu0 %v4023_v27  ;;  %v4057_v36 = vpack.c.bf16 %v128_v33, %v108_v31  ;;  %v4027_v37 = vpack.c.bf16 %v167_v35, %v147_v34  ;;  %v149_v38 = vld [vmem:[%s6396_s1 + $0x298] sm:$0xff]  ;;  %v146_v40 = vld [vmem:[%s6396_s1 + $0x280] sm:$0xff]  ;;  %v148_v43 = vld [vmem:[%s6396_s1 + $0x290] sm:$0xff] }
   0xf   : > { %4056 = vmatprep.subr.bf16.mxu1 %v4055_v28  ;;  %v169_v39 = vld [vmem:[%s6396_s1 + $0x338] sm:$0xff]  ;;  %v166_v42 = vld [vmem:[%s6396_s1 + $0x320] sm:$0xff]  ;;  %v168_v44 = vld [vmem:[%s6396_s1 + $0x330] sm:$0xff] }
  0x10   : > { %v4059_v41 = vpack.c.bf16 %v169_v39, %v149_v38  ;;  %v4029_v45 = vpack.c.bf16 %v166_v42, %v146_v40  ;;  %v187_v46 = vld [vmem:[%s6396_s1 + $0x3c8] sm:$0xff]  ;;  %v189_v48 = vld [vmem:[%s6396_s1 + $0x3d8] sm:$0xff]  ;;  %v4061_v49 = vpack.c.bf16 %v168_v44, %v148_v43  ;;  %v186_v52 = vld [vmem:[%s6396_s1 + $0x3c0] sm:$0xff] }
  0x11   : > { %4026 = vmatpush1.bf16.msra.mxu0 %v4025_v32  ;;  %v207_v47 = vld [vmem:[%s6396_s1 + $0x468] sm:$0xff]  ;;  %v209_v51 = vld [vmem:[%s6396_s1 + $0x478] sm:$0xff]  ;;  %v206_v53 = vld [vmem:[%s6396_s1 + $0x460] sm:$0xff] }
  0x12   : > { %4058 = vmatpush1.bf16.msra.mxu1 %v4057_v36  ;;  %4028 = vmatprep.subr.bf16.mxu0 %v4027_v37  ;;  %v4031_v50 = vpack.c.bf16 %v207_v47, %v187_v46  ;;  %v4063_v54 = vpack.c.bf16 %v209_v51, %v189_v48  ;;  %v188_v55 = vld [vmem:[%s6396_s1 + $0x3d0] sm:$0xff]  ;;  %v227_v57 = vld [vmem:[%s6396_s1 + $0x508] sm:$0xff]  ;;  %v229_v59 = vld [vmem:[%s6396_s1 + $0x518] sm:$0xff]  ;;  %v4033_v61 = vpack.c.bf16 %v206_v53, %v186_v52 }
  0x13   : > { %4060 = vmatprep.subr.bf16.mxu1 %v4059_v41  ;;  %v208_v56 = vld [vmem:[%s6396_s1 + $0x470] sm:$0xff]  ;;  %v247_v58 = vld [vmem:[%s6396_s1 + $0x5a8] sm:$0xff]  ;;  %v249_v60 = vld [vmem:[%s6396_s1 + $0x5b8] sm:$0xff] }
  0x14   : > { %v4065_v62 = vpack.c.bf16 %v208_v56, %v188_v55  ;;  %v4035_v63 = vpack.c.bf16 %v247_v58, %v227_v57  ;;  %v226_v1 = vld [vmem:[%s6396_s1 + $0x500] sm:$0xff]  ;;  %v228_v11 = vld [vmem:[%s6396_s1 + $0x510] sm:$0xff]  ;;  %v4067_v12 = vpack.c.bf16 %v249_v60, %v229_v59  ;;  %v267_v14 = vld [vmem:[%s6396_s1 + $0x648] sm:$0xff] }
  0x15   : > { %4030 = vmatpush1.bf16.msra.mxu0 %v4029_v45  ;;  %v246_v10 = vld [vmem:[%s6396_s1 + $0x5a0] sm:$0xff]  ;;  %v248_v13 = vld [vmem:[%s6396_s1 + $0x5b0] sm:$0xff]  ;;  %v287_v15 = vld [vmem:[%s6396_s1 + $0x6e8] sm:$0xff] }
  0x16   : > { %4062 = vmatpush1.bf16.msra.mxu1 %v4061_v49  ;;  %4032 = vmatprep.subr.bf16.mxu0 %v4031_v50  ;;  %v269_v16 = vld [vmem:[%s6396_s1 + $0x658] sm:$0xff]  ;;  %v4037_v19 = vpack.c.bf16 %v246_v10, %v226_v1  ;;  %v4069_v20 = vpack.c.bf16 %v248_v13, %v228_v11  ;;  %v4039_v21 = vpack.c.bf16 %v287_v15, %v267_v14  ;;  %v266_v22 = vld [vmem:[%s6396_s1 + $0x640] sm:$0xff]  ;;  %v268_v24 = vld [vmem:[%s6396_s1 + $0x650] sm:$0xff] }
  0x17   : > { %4064 = vmatprep.subr.bf16.mxu1 %v4063_v54  ;;  %v289_v18 = vld [vmem:[%s6396_s1 + $0x6f8] sm:$0xff]  ;;  %v286_v23 = vld [vmem:[%s6396_s1 + $0x6e0] sm:$0xff]  ;;  %v288_v26 = vld [vmem:[%s6396_s1 + $0x6f0] sm:$0xff] }
  0x18   : > { %v4071_v25 = vpack.c.bf16 %v289_v18, %v269_v16  ;;  %v307_v27 = vld [vmem:[%s6396_s1 + $0x788] sm:$0xff]  ;;  %v309_v29 = vld [vmem:[%s6396_s1 + $0x798] sm:$0xff]  ;;  %v4041_v31 = vpack.c.bf16 %v286_v23, %v266_v22  ;;  %v4073_v32 = vpack.c.bf16 %v288_v26, %v268_v24  ;;  %v306_v34 = vld [vmem:[%s6396_s1 + $0x780] sm:$0xff] }
  0x19   : > { %4034 = vmatpush1.bf16.msra.mxu0 %v4033_v61  ;;  %v327_v28 = vld [vmem:[%s6396_s1 + $0x828] sm:$0xff]  ;;  %v329_v30 = vld [vmem:[%s6396_s1 + $0x838] sm:$0xff]  ;;  %v326_v35 = vld [vmem:[%s6396_s1 + $0x820] sm:$0xff] }
  0x1a   : > { %4066 = vmatpush1.bf16.msra.mxu1 %v4065_v62  ;;  %4036 = vmatprep.subr.bf16.mxu0 %v4035_v63  ;;  %v4043_v33 = vpack.c.bf16 %v327_v28, %v307_v27  ;;  %v308_v36 = vld [vmem:[%s6396_s1 + $0x790] sm:$0xff]  ;;  %v4075_v37 = vpack.c.bf16 %v329_v30, %v309_v29  ;;  %v347_v39 = vld [vmem:[%s6396_s1 + $0x8c8] sm:$0xff]  ;;  %v349_v41 = vld [vmem:[%s6396_s1 + $0x8d8] sm:$0xff]  ;;  %v4045_v43 = vpack.c.bf16 %v326_v35, %v306_v34 }
  0x1b   : > { %4068 = vmatprep.subr.bf16.mxu1 %v4067_v12  ;;  %v328_v38 = vld [vmem:[%s6396_s1 + $0x830] sm:$0xff]  ;;  %v367_v40 = vld [vmem:[%s6396_s1 + $0x968] sm:$0xff]  ;;  %v369_v42 = vld [vmem:[%s6396_s1 + $0x978] sm:$0xff] }
  0x1c   : > { %v4077_v44 = vpack.c.bf16 %v328_v38, %v308_v36  ;;  %v4047_v45 = vpack.c.bf16 %v367_v40, %v347_v39  ;;  %v346_v46 = vld [vmem:[%s6396_s1 + $0x8c0] sm:$0xff]  ;;  %v348_v48 = vld [vmem:[%s6396_s1 + $0x8d0] sm:$0xff]  ;;  %v4079_v49 = vpack.c.bf16 %v369_v42, %v349_v41  ;;  %v71_v51 = vld [vmem:[%s6396_s1 + $0x28] sm:$0xff] }
  0x1d   : > { %4038 = vmatpush1.bf16.msra.mxu0 %v4037_v19  ;;  %v366_v47 = vld [vmem:[%s6396_s1 + $0x960] sm:$0xff]  ;;  %v368_v50 = vld [vmem:[%s6396_s1 + $0x970] sm:$0xff]  ;;  %v91_v52 = vld [vmem:[%s6396_s1 + $0xc8] sm:$0xff] }
  0x1e   : > { %4070 = vmatpush1.bf16.msra.mxu1 %v4069_v20  ;;  %4040 = vmatprep.subr.bf16.mxu0 %v4039_v21  ;;  %v73_v53 = vld [vmem:[%s6396_s1 + $0x38] sm:$0xff]  ;;  %v4049_v55 = vpack.c.bf16 %v366_v47, %v346_v46  ;;  %v4081_v56 = vpack.c.bf16 %v368_v50, %v348_v48  ;;  %v4083_v57 = vpack.c.bf16 %v91_v52, %v71_v51  ;;  %v70_v58 = vld [vmem:[%s6396_s1 + $0x20] sm:$0xff]  ;;  %v72_v60 = vld [vmem:[%s6396_s1 + $0x30] sm:$0xff] }
  0x1f   : > { %4072 = vmatprep.subr.bf16.mxu1 %v4071_v25  ;;  %v93_v54 = vld [vmem:[%s6396_s1 + $0xd8] sm:$0xff]  ;;  %v90_v59 = vld [vmem:[%s6396_s1 + $0xc0] sm:$0xff]  ;;  %v92_v62 = vld [vmem:[%s6396_s1 + $0xd0] sm:$0xff] }
  0x20   : > { %v4115_v61 = vpack.c.bf16 %v93_v54, %v73_v53  ;;  %v111_v63 = vld [vmem:[%s6396_s1 + $0x168] sm:$0xff]  ;;  %v113_v10 = vld [vmem:[%s6396_s1 + $0x178] sm:$0xff]  ;;  %v4906_v12 = vld [vmem:[%s4879_s15] sm:$0x1]  ;;  %v4085_v13 = vpack.c.bf16 %v90_v59, %v70_v58  ;;  %v4117_v14 = vpack.c.bf16 %v92_v62, %v72_v60 }
  0x21   : > { %4042 = vmatpush1.bf16.msra.mxu0 %v4041_v31  ;;  %v131_v1 = vld [vmem:[%s6396_s1 + $0x208] sm:$0xff]  ;;  %v133_v11 = vld [vmem:[%s6396_s1 + $0x218] sm:$0xff]  ;;  %v110_v16 = vld [vmem:[%s6396_s1 + $0x160] sm:$0xff] }
  0x22   : > { %4074 = vmatpush1.bf16.msra.mxu1 %v4073_v32  ;;  %4044 = vmatprep.subr.bf16.mxu0 %v4043_v33  ;;  %v4087_v15 = vpack.c.bf16 %v131_v1, %v111_v63  ;;  %v130_v18 = vld [vmem:[%s6396_s1 + $0x200] sm:$0xff]  ;;  %v112_v19 = vld [vmem:[%s6396_s1 + $0x170] sm:$0xff]  ;;  %v4119_v20 = vpack.c.bf16 %v133_v11, %v113_v10  ;;  %v151_v22 = vld [vmem:[%s6396_s1 + $0x2a8] sm:$0xff] }
  0x23   : > { %4076 = vmatprep.subr.bf16.mxu1 %v4075_v37  ;;  %v132_v21 = vld [vmem:[%s6396_s1 + $0x210] sm:$0xff]  ;;  %v171_v23 = vld [vmem:[%s6396_s1 + $0x348] sm:$0xff]  ;;  %v153_v24 = vld [vmem:[%s6396_s1 + $0x2b8] sm:$0xff]  ;;  %v4089_v26 = vpack.c.bf16 %v130_v18, %v110_v16 }
  0x24   : > { %v173_v25 = vld [vmem:[%s6396_s1 + $0x358] sm:$0xff]  ;;  %v4121_v27 = vpack.c.bf16 %v132_v21, %v112_v19  ;;  %v4091_v28 = vpack.c.bf16 %v171_v23, %v151_v22  ;;  %v150_v29 = vld [vmem:[%s6396_s1 + $0x2a0] sm:$0xff]  ;;  %v152_v31 = vld [vmem:[%s6396_s1 + $0x2b0] sm:$0xff] }
  0x25   : > { %4046 = vmatpush1.bf16.msra.mxu0 %v4045_v43  ;;  %v170_v30 = vld [vmem:[%s6396_s1 + $0x340] sm:$0xff]  ;;  %v4123_v32 = vpack.c.bf16 %v173_v25, %v153_v24  ;;  %v172_v33 = vld [vmem:[%s6396_s1 + $0x350] sm:$0xff]  ;;  %v191_v34 = vld [vmem:[%s6396_s1 + $0x3e8] sm:$0xff] }
  0x26   : > { %4078 = vmatpush1.bf16.msra.mxu1 %v4077_v44  ;;  %4048 = vmatprep.subr.bf16.mxu0 %v4047_v45  ;;  %v211_v35 = vld [vmem:[%s6396_s1 + $0x488] sm:$0xff]  ;;  %v193_v36 = vld [vmem:[%s6396_s1 + $0x3f8] sm:$0xff]  ;;  %v4093_v38 = vpack.c.bf16 %v170_v30, %v150_v29  ;;  %v4125_v39 = vpack.c.bf16 %v172_v33, %v152_v31  ;;  %v190_v41 = vld [vmem:[%s6396_s1 + $0x3e0] sm:$0xff] }
  0x27   : > { %4080 = vmatprep.subr.bf16.mxu1 %v4079_v49  ;;  %v213_v37 = vld [vmem:[%s6396_s1 + $0x498] sm:$0xff]  ;;  %v4095_v40 = vpack.c.bf16 %v211_v35, %v191_v34  ;;  %v210_v42 = vld [vmem:[%s6396_s1 + $0x480] sm:$0xff]  ;;  %v192_v43 = vld [vmem:[%s6396_s1 + $0x3f0] sm:$0xff] }
  0x28   : > { %v4127_v44 = vpack.c.bf16 %v213_v37, %v193_v36  ;;  %v212_v45 = vld [vmem:[%s6396_s1 + $0x490] sm:$0xff]  ;;  %v231_v46 = vld [vmem:[%s6396_s1 + $0x528] sm:$0xff]  ;;  %v233_v48 = vld [vmem:[%s6396_s1 + $0x538] sm:$0xff]  ;;  %v4097_v50 = vpack.c.bf16 %v210_v42, %v190_v41 }
  0x29   : > { %4050 = vmatpush1.bf16.msra.mxu0 %v4049_v55  ;;  %v251_v47 = vld [vmem:[%s6396_s1 + $0x5c8] sm:$0xff]  ;;  %v253_v49 = vld [vmem:[%s6396_s1 + $0x5d8] sm:$0xff]  ;;  %v4129_v51 = vpack.c.bf16 %v212_v45, %v192_v43  ;;  %v230_v53 = vld [vmem:[%s6396_s1 + $0x520] sm:$0xff] }
  0x2a   : > { %4082 = vmatpush1.bf16.msra.mxu1 %v4081_v56  ;;  %4084 = vmatprep.subr.bf16.mxu0 %v4083_v57  ;;  %v4099_v52 = vpack.c.bf16 %v251_v47, %v231_v46  ;;  %v250_v54 = vld [vmem:[%s6396_s1 + $0x5c0] sm:$0xff]  ;;  %v232_v55 = vld [vmem:[%s6396_s1 + $0x530] sm:$0xff]  ;;  %v4131_v56 = vpack.c.bf16 %v253_v49, %v233_v48  ;;  %v271_v58 = vld [vmem:[%s6396_s1 + $0x668] sm:$0xff] }
  0x2b   : > { %4116 = vmatprep.subr.bf16.mxu1 %v4115_v61  ;;  %v252_v57 = vld [vmem:[%s6396_s1 + $0x5d0] sm:$0xff]  ;;  %v291_v59 = vld [vmem:[%s6396_s1 + $0x708] sm:$0xff]  ;;  %v273_v60 = vld [vmem:[%s6396_s1 + $0x678] sm:$0xff]  ;;  %v4101_v62 = vpack.c.bf16 %v250_v54, %v230_v53 }
  0x2c   : > { %554 = vmatmul.mubr.f32.vlgmr.msra.gmra.mrb[0].mxu0 %v4906_v12  ;;  %v293_v61 = vld [vmem:[%s6396_s1 + $0x718] sm:$0xff]  ;;  %v4133_v63 = vpack.c.bf16 %v252_v57, %v232_v55  ;;  %v4103_v1 = vpack.c.bf16 %v291_v59, %v271_v58  ;;  %v270_v10 = vld [vmem:[%s6396_s1 + $0x660] sm:$0xff]  ;;  %v311_v16 = vld [vmem:[%s6396_s1 + $0x7a8] sm:$0xff] }
  0x2d   : > { %625 = vmatmul.mubr.f32.vlgmr.msra.gmra.mrb[0].mxu1 %v4906_v12  ;;  %4086 = vmatpush1.bf16.msra.mxu0 %v4085_v13  ;;  %v290_v11 = vld [vmem:[%s6396_s1 + $0x700] sm:$0xff]  ;;  %v272_v13 = vld [vmem:[%s6396_s1 + $0x670] sm:$0xff]  ;;  %v331_v18 = vld [vmem:[%s6396_s1 + $0x848] sm:$0xff] }
  0x2e   : > { %4118 = vmatpush1.bf16.msra.mxu1 %v4117_v14  ;;  %4088 = vmatprep.subr.bf16.mxu0 %v4087_v15  ;;  %v4135_v14 = vpack.c.bf16 %v293_v61, %v273_v60  ;;  %v292_v15 = vld [vmem:[%s6396_s1 + $0x710] sm:$0xff]  ;;  %v313_v19 = vld [vmem:[%s6396_s1 + $0x7b8] sm:$0xff]  ;;  %v4105_v21 = vpack.c.bf16 %v290_v11, %v270_v10  ;;  %v4107_v23 = vpack.c.bf16 %v331_v18, %v311_v16  ;;  %v310_v24 = vld [vmem:[%s6396_s1 + $0x7a0] sm:$0xff] }
  0x2f   : > { %4120 = vmatprep.subr.bf16.mxu1 %v4119_v20  ;;  %695 = vmatprep.mubr.f32.mxu0 %v4562_v17  ;;  %v333_v20 = vld [vmem:[%s6396_s1 + $0x858] sm:$0xff]  ;;  %v4137_v22 = vpack.c.bf16 %v292_v15, %v272_v13  ;;  %v330_v25 = vld [vmem:[%s6396_s1 + $0x840] sm:$0xff]  ;;  %v351_v29 = vld [vmem:[%s6396_s1 + $0x8e8] sm:$0xff] }
  0x30   : > { %766 = vmatprep.mubr.f32.mxu1 %v4562_v17  ;;  %v371_v30 = vld [vmem:[%s6396_s1 + $0x988] sm:$0xff]  ;;  %v353_v31 = vld [vmem:[%s6396_s1 + $0x8f8] sm:$0xff]  ;;  %v4109_v33 = vpack.c.bf16 %v330_v25, %v310_v24  ;;  %v350_v36 = vld [vmem:[%s6396_s1 + $0x8e0] sm:$0xff] }
  0x31   : > { %4090 = vmatpush1.bf16.msra.mxu0 %v4089_v26  ;;  %v312_v26 = vld [vmem:[%s6396_s1 + $0x7b0] sm:$0xff]  ;;  %v4111_v35 = vpack.c.bf16 %v371_v30, %v351_v29  ;;  %v370_v37 = vld [vmem:[%s6396_s1 + $0x980] sm:$0xff]  ;;  %v75_v41 = vld [vmem:[%s6396_s1 + $0x48] sm:$0xff] }
  0x32   : > { %4122 = vmatpush1.bf16.msra.mxu1 %v4121_v27  ;;  %4092 = vmatprep.subr.bf16.mxu0 %v4091_v28  ;;  %v4139_v27 = vpack.c.bf16 %v333_v20, %v313_v19  ;;  %v332_v28 = vld [vmem:[%s6396_s1 + $0x850] sm:$0xff]  ;;  %v95_v42 = vld [vmem:[%s6396_s1 + $0xe8] sm:$0xff]  ;;  %v77_v43 = vld [vmem:[%s6396_s1 + $0x58] sm:$0xff]  ;;  %v4113_v45 = vpack.c.bf16 %v370_v37, %v350_v36 }
  0x33   : > { %4124 = vmatprep.subr.bf16.mxu1 %v4123_v32  ;;  %v373_v32 = vld [vmem:[%s6396_s1 + $0x998] sm:$0xff]  ;;  %v4141_v34 = vpack.c.bf16 %v332_v28, %v312_v26  ;;  %v4147_v47 = vpack.c.bf16 %v95_v42, %v75_v41  ;;  %v74_v48 = vld [vmem:[%s6396_s1 + $0x40] sm:$0xff]  ;;  %v115_v53 = vld [vmem:[%s6396_s1 + $0x188] sm:$0xff] }
  0x34   : > { %v94_v49 = vld [vmem:[%s6396_s1 + $0xe0] sm:$0xff]  ;;  %v135_v54 = vld [vmem:[%s6396_s1 + $0x228] sm:$0xff]  ;;  %v117_v55 = vld [vmem:[%s6396_s1 + $0x198] sm:$0xff] }
  0x35   : > { %4094 = vmatpush1.bf16.msra.mxu0 %v4093_v38  ;;  %v352_v38 = vld [vmem:[%s6396_s1 + $0x8f0] sm:$0xff]  ;;  %v4149_v57 = vpack.c.bf16 %v94_v49, %v74_v48  ;;  %v4151_v59 = vpack.c.bf16 %v135_v54, %v115_v53  ;;  %v114_v60 = vld [vmem:[%s6396_s1 + $0x180] sm:$0xff]  ;;  %v155_v10 = vld [vmem:[%s6396_s1 + $0x2c8] sm:$0xff] }
  0x36   : > { %4126 = vmatpush1.bf16.msra.mxu1 %v4125_v39  ;;  %4096 = vmatprep.subr.bf16.mxu0 %v4095_v40  ;;  %v4143_v39 = vpack.c.bf16 %v373_v32, %v353_v31  ;;  %v372_v40 = vld [vmem:[%s6396_s1 + $0x990] sm:$0xff]  ;;  %v134_v61 = vld [vmem:[%s6396_s1 + $0x220] sm:$0xff]  ;;  %v175_v11 = vld [vmem:[%s6396_s1 + $0x368] sm:$0xff] }
  0x37   : > { %4128 = vmatprep.subr.bf16.mxu1 %v4127_v44  ;;  %v97_v44 = vld [vmem:[%s6396_s1 + $0xf8] sm:$0xff]  ;;  %v4145_v46 = vpack.c.bf16 %v372_v40, %v352_v38  ;;  %v4153_v15 = vpack.c.bf16 %v134_v61, %v114_v60  ;;  %v4155_v18 = vpack.c.bf16 %v175_v11, %v155_v10  ;;  %v154_v19 = vld [vmem:[%s6396_s1 + $0x2c0] sm:$0xff]  ;;  %v195_v24 = vld [vmem:[%s6396_s1 + $0x408] sm:$0xff] }
  0x38   : > { %v157_v13 = vld [vmem:[%s6396_s1 + $0x2d8] sm:$0xff]  ;;  %v174_v20 = vld [vmem:[%s6396_s1 + $0x360] sm:$0xff]  ;;  %v215_v25 = vld [vmem:[%s6396_s1 + $0x4a8] sm:$0xff] }
  0x39   : > { %4098 = vmatpush1.bf16.msra.mxu0 %v4097_v50  ;;  %v76_v50 = vld [vmem:[%s6396_s1 + $0x50] sm:$0xff]  ;;  %v197_v26 = vld [vmem:[%s6396_s1 + $0x418] sm:$0xff]  ;;  %v4157_v28 = vpack.c.bf16 %v174_v20, %v154_v19  ;;  %v4159_v30 = vpack.c.bf16 %v215_v25, %v195_v24  ;;  %v194_v31 = vld [vmem:[%s6396_s1 + $0x400] sm:$0xff] }
  0x3a   : > { %4130 = vmatpush1.bf16.msra.mxu1 %v4129_v51  ;;  %4100 = vmatprep.subr.bf16.mxu0 %v4099_v52  ;;  %v4179_v51 = vpack.c.bf16 %v97_v44, %v77_v43  ;;  %v96_v52 = vld [vmem:[%s6396_s1 + $0xf0] sm:$0xff]  ;;  %v214_v32 = vld [vmem:[%s6396_s1 + $0x4a0] sm:$0xff]  ;;  %v235_v36 = vld [vmem:[%s6396_s1 + $0x548] sm:$0xff] }
  0x3b   : > { %4132 = vmatprep.subr.bf16.mxu1 %v4131_v56  ;;  %v137_v56 = vld [vmem:[%s6396_s1 + $0x238] sm:$0xff]  ;;  %v4181_v58 = vpack.c.bf16 %v96_v52, %v76_v50  ;;  %v255_v37 = vld [vmem:[%s6396_s1 + $0x5e8] sm:$0xff]  ;;  %v4161_v40 = vpack.c.bf16 %v214_v32, %v194_v31  ;;  %v234_v43 = vld [vmem:[%s6396_s1 + $0x540] sm:$0xff] }
  0x3c   : > { %v237_v38 = vld [vmem:[%s6396_s1 + $0x558] sm:$0xff]  ;;  %v4163_v42 = vpack.c.bf16 %v255_v37, %v235_v36  ;;  %v254_v44 = vld [vmem:[%s6396_s1 + $0x5e0] sm:$0xff]  ;;  %v275_v48 = vld [vmem:[%s6396_s1 + $0x688] sm:$0xff] }
  0x3d   : > { %4102 = vmatpush1.bf16.msra.mxu0 %v4101_v62  ;;  %v116_v62 = vld [vmem:[%s6396_s1 + $0x190] sm:$0xff]  ;;  %v295_v49 = vld [vmem:[%s6396_s1 + $0x728] sm:$0xff]  ;;  %v277_v50 = vld [vmem:[%s6396_s1 + $0x698] sm:$0xff]  ;;  %v4165_v52 = vpack.c.bf16 %v254_v44, %v234_v43 }
  0x3e   : > { %4134 = vmatpush1.bf16.msra.mxu1 %v4133_v63  ;;  %4104 = vmatprep.subr.bf16.mxu0 %v4103_v1  ;;  %v4183_v63 = vpack.c.bf16 %v137_v56, %v117_v55  ;;  %v136_v1 = vld [vmem:[%s6396_s1 + $0x230] sm:$0xff]  ;;  %v4167_v54 = vpack.c.bf16 %v295_v49, %v275_v48  ;;  %v274_v55 = vld [vmem:[%s6396_s1 + $0x680] sm:$0xff]  ;;  %v315_v60 = vld [vmem:[%s6396_s1 + $0x7c8] sm:$0xff] }
  0x3f   : > { %4136 = vmatprep.subr.bf16.mxu1 %v4135_v14  ;;  %v177_v14 = vld [vmem:[%s6396_s1 + $0x378] sm:$0xff]  ;;  %v4185_v16 = vpack.c.bf16 %v136_v1, %v116_v62  ;;  %v294_v56 = vld [vmem:[%s6396_s1 + $0x720] sm:$0xff]  ;;  %v335_v61 = vld [vmem:[%s6396_s1 + $0x868] sm:$0xff] }
  0x40   : > { %v317_v62 = vld [vmem:[%s6396_s1 + $0x7d8] sm:$0xff]  ;;  %v4169_v1 = vpack.c.bf16 %v294_v56, %v274_v55  ;;  %v4171_v11 = vpack.c.bf16 %v335_v61, %v315_v60  ;;  %v355_v19 = vld [vmem:[%s6396_s1 + $0x908] sm:$0xff] }
  0x41   : > { %4106 = vmatpush1.bf16.msra.mxu0 %v4105_v21  ;;  %v156_v21 = vld [vmem:[%s6396_s1 + $0x2d0] sm:$0xff]  ;;  %v375_v20 = vld [vmem:[%s6396_s1 + $0x9a8] sm:$0xff] }
  0x42   : > { %4138 = vmatpush1.bf16.msra.mxu1 %v4137_v22  ;;  %4108 = vmatprep.subr.bf16.mxu0 %v4107_v23  ;;  %v4187_v22 = vpack.c.bf16 %v177_v14, %v157_v13  ;;  %v176_v23 = vld [vmem:[%s6396_s1 + $0x370] sm:$0xff]  ;;  %v314_v13 = vld [vmem:[%s6396_s1 + $0x7c0] sm:$0xff]  ;;  %v4175_v25 = vpack.c.bf16 %v375_v20, %v355_v19  ;;  %v79_v31 = vld [vmem:[%s6396_s1 + $0x68] sm:$0xff] }
  0x43   : > { %4140 = vmatprep.subr.bf16.mxu1 %v4139_v27  ;;  %v217_v27 = vld [vmem:[%s6396_s1 + $0x4b8] sm:$0xff]  ;;  %v4189_v29 = vpack.c.bf16 %v176_v23, %v156_v21  ;;  %v334_v14 = vld [vmem:[%s6396_s1 + $0x860] sm:$0xff]  ;;  %v99_v32 = vld [vmem:[%s6396_s1 + $0x108] sm:$0xff] }
  0x44   : > { %v357_v21 = vld [vmem:[%s6396_s1 + $0x918] sm:$0xff]  ;;  %v4173_v23 = vpack.c.bf16 %v334_v14, %v314_v13  ;;  %v4211_v37 = vpack.c.bf16 %v99_v32, %v79_v31  ;;  %v119_v43 = vld [vmem:[%s6396_s1 + $0x1a8] sm:$0xff]  ;;  %v198_v19 = vld [vmem:[%s6396_s1 + $0x420] sm:$0xff] }
  0x45   : > { %4110 = vmatpush1.bf16.msra.mxu0 %v4109_v33  ;;  %v196_v33 = vld [vmem:[%s6396_s1 + $0x410] sm:$0xff]  ;;  %v139_v44 = vld [vmem:[%s6396_s1 + $0x248] sm:$0xff]  ;;  %v218_v20 = vld [vmem:[%s6396_s1 + $0x4c0] sm:$0xff] }
  0x46   : > { %4142 = vmatpush1.bf16.msra.mxu1 %v4141_v34  ;;  %4112 = vmatprep.subr.bf16.mxu0 %v4111_v35  ;;  %v4191_v34 = vpack.c.bf16 %v217_v27, %v197_v26  ;;  %v216_v35 = vld [vmem:[%s6396_s1 + $0x4b0] sm:$0xff]  ;;  %v354_v26 = vld [vmem:[%s6396_s1 + $0x900] sm:$0xff]  ;;  %v4215_v49 = vpack.c.bf16 %v139_v44, %v119_v43  ;;  %v159_v55 = vld [vmem:[%s6396_s1 + $0x2e8] sm:$0xff]  ;;  %v4225_v32 = vpack.c.bf16 %v218_v20, %v198_v19 }
  0x47   : > { %4144 = vmatprep.subr.bf16.mxu1 %v4143_v39  ;;  %v257_v39 = vld [vmem:[%s6396_s1 + $0x5f8] sm:$0xff]  ;;  %v4193_v41 = vpack.c.bf16 %v216_v35, %v196_v33  ;;  %v374_v27 = vld [vmem:[%s6396_s1 + $0x9a0] sm:$0xff]  ;;  %v179_v56 = vld [vmem:[%s6396_s1 + $0x388] sm:$0xff] }
  0x48   : > { %v81_v33 = vld [vmem:[%s6396_s1 + $0x78] sm:$0xff]  ;;  %v4177_v35 = vpack.c.bf16 %v374_v27, %v354_v26  ;;  %v4219_v61 = vpack.c.bf16 %v179_v56, %v159_v55  ;;  %v199_v13 = vld [vmem:[%s6396_s1 + $0x428] sm:$0xff]  ;;  %v258_v31 = vld [vmem:[%s6396_s1 + $0x600] sm:$0xff] }
  0x49   : > { %4114 = vmatpush1.bf16.msra.mxu0 %v4113_v45  ;;  %v236_v45 = vld [vmem:[%s6396_s1 + $0x550] sm:$0xff]  ;;  %v219_v14 = vld [vmem:[%s6396_s1 + $0x4c8] sm:$0xff]  ;;  %v298_v43 = vld [vmem:[%s6396_s1 + $0x740] sm:$0xff] }
  0x4a   : > { %4146 = vmatpush1.bf16.msra.mxu1 %v4145_v46  ;;  %4148 = vmatprep.subr.bf16.mxu0 %v4147_v47  ;;  %v4195_v46 = vpack.c.bf16 %v257_v39, %v237_v38  ;;  %v256_v47 = vld [vmem:[%s6396_s1 + $0x5f0] sm:$0xff]  ;;  %v78_v38 = vld [vmem:[%s6396_s1 + $0x60] sm:$0xff]  ;;  %v259_v27 = vld [vmem:[%s6396_s1 + $0x608] sm:$0xff] }
  0x4b   : > { %4180 = vmatprep.subr.bf16.mxu1 %v4179_v51  ;;  %v297_v51 = vld [vmem:[%s6396_s1 + $0x738] sm:$0xff]  ;;  %v4197_v53 = vpack.c.bf16 %v256_v47, %v236_v45  ;;  %v98_v39 = vld [vmem:[%s6396_s1 + $0x100] sm:$0xff]  ;;  %v103_v19 = vld [vmem:[%s6396_s1 + $0x128] sm:$0xff] }
  0x4c   : > { %696 = vmatmul.mubr.f32.vlgmr.msra.gmra.mrb[2].mxu0 %v4906_v12  ;;  %v121_v45 = vld [vmem:[%s6396_s1 + $0x1b8] sm:$0xff]  ;;  %v4213_v47 = vpack.c.bf16 %v98_v39, %v78_v38  ;;  %v338_v55 = vld [vmem:[%s6396_s1 + $0x880] sm:$0xff] }
  0x4d   : > { %767 = vmatmul.mubr.f32.vlgmr.msra.gmra.mrb[2].mxu1 %v4906_v12  ;;  %4150 = vmatpush1.bf16.msra.mxu0 %v4149_v57  ;;  %v276_v57 = vld [vmem:[%s6396_s1 + $0x690] sm:$0xff]  ;;  %v281_v39 = vld [vmem:[%s6396_s1 + $0x6b8] sm:$0xff] }
  0x4e   : > { %4182 = vmatpush1.bf16.msra.mxu1 %v4181_v58  ;;  %4152 = vmatprep.subr.bf16.mxu0 %v4151_v59  ;;  %v4199_v58 = vpack.c.bf16 %v297_v51, %v277_v50  ;;  %v296_v59 = vld [vmem:[%s6396_s1 + $0x730] sm:$0xff]  ;;  %v118_v50 = vld [vmem:[%s6396_s1 + $0x1a0] sm:$0xff] }
  0x4f   : > { %4184 = vmatprep.subr.bf16.mxu1 %v4183_v63  ;;  %837 = vmatprep.mubr.f32.mxu0 %v4562_v17  ;;  %v337_v63 = vld [vmem:[%s6396_s1 + $0x878] sm:$0xff]  ;;  %v4201_v10 = vpack.c.bf16 %v296_v59, %v276_v57  ;;  %v138_v51 = vld [vmem:[%s6396_s1 + $0x240] sm:$0xff] }
  0x50   : > { %908 = vmatprep.mubr.f32.mxu1 %v4562_v17  ;;  %v161_v57 = vld [vmem:[%s6396_s1 + $0x2f8] sm:$0xff]  ;;  %v4217_v59 = vpack.c.bf16 %v138_v51, %v118_v50 }
  0x51   : > { %4154 = vmatpush1.bf16.msra.mxu0 %v4153_v15  ;;  %v316_v15 = vld [vmem:[%s6396_s1 + $0x7d0] sm:$0xff]  ;;  %v321_v51 = vld [vmem:[%s6396_s1 + $0x7f8] sm:$0xff] }
  0x52   : > { %4186 = vmatpush1.bf16.msra.mxu1 %v4185_v16  ;;  %4156 = vmatprep.subr.bf16.mxu0 %v4155_v18  ;;  %v4203_v16 = vpack.c.bf16 %v337_v63, %v317_v62  ;;  %v336_v18 = vld [vmem:[%s6396_s1 + $0x870] sm:$0xff]  ;;  %v158_v62 = vld [vmem:[%s6396_s1 + $0x2e0] sm:$0xff] }
  0x53   : > { %4188 = vmatprep.subr.bf16.mxu1 %v4187_v22  ;;  %v377_v22 = vld [vmem:[%s6396_s1 + $0x9b8] sm:$0xff]  ;;  %v4205_v24 = vpack.c.bf16 %v336_v18, %v316_v15  ;;  %v178_v63 = vld [vmem:[%s6396_s1 + $0x380] sm:$0xff] }
  0x54   : > { %v201_v15 = vld [vmem:[%s6396_s1 + $0x438] sm:$0xff]  ;;  %v4221_v18 = vpack.c.bf16 %v178_v63, %v158_v62 }
  0x55   : > { %4158 = vmatpush1.bf16.msra.mxu0 %v4157_v28  ;;  %v356_v28 = vld [vmem:[%s6396_s1 + $0x910] sm:$0xff]  ;;  %v361_v63 = vld [vmem:[%s6396_s1 + $0x938] sm:$0xff] }
  0x56   : > { %4190 = vmatpush1.bf16.msra.mxu1 %v4189_v29  ;;  %4160 = vmatprep.subr.bf16.mxu0 %v4159_v30  ;;  %v4207_v29 = vpack.c.bf16 %v377_v22, %v357_v21  ;;  %v376_v30 = vld [vmem:[%s6396_s1 + $0x9b0] sm:$0xff]  ;;  %v4223_v22 = vpack.c.bf16 %v219_v14, %v199_v13  ;;  %v378_v13 = vld [vmem:[%s6396_s1 + $0x9c0] sm:$0xff] }
  0x57   : > { %4192 = vmatprep.subr.bf16.mxu1 %v4191_v34  ;;  %v101_v34 = vld [vmem:[%s6396_s1 + $0x118] sm:$0xff]  ;;  %v4209_v36 = vpack.c.bf16 %v376_v30, %v356_v28  ;;  %v238_v30 = vld [vmem:[%s6396_s1 + $0x560] sm:$0xff] }
  0x58   : > { %v241_v28 = vld [vmem:[%s6396_s1 + $0x578] sm:$0xff]  ;;  %v4229_v44 = vpack.c.bf16 %v258_v31, %v238_v30  ;;  %v123_v30 = vld [vmem:[%s6396_s1 + $0x1c8] sm:$0xff] }
  0x59   : > { %4162 = vmatpush1.bf16.msra.mxu0 %v4161_v40  ;;  %v80_v40 = vld [vmem:[%s6396_s1 + $0x70] sm:$0xff]  ;;  %v143_v31 = vld [vmem:[%s6396_s1 + $0x268] sm:$0xff] }
  0x5a   : > { %4194 = vmatpush1.bf16.msra.mxu1 %v4193_v41  ;;  %4164 = vmatprep.subr.bf16.mxu0 %v4163_v42  ;;  %v4243_v41 = vpack.c.bf16 %v101_v34, %v81_v33  ;;  %v100_v42 = vld [vmem:[%s6396_s1 + $0x110] sm:$0xff] }
  0x5b   : > { %4196 = vmatprep.subr.bf16.mxu1 %v4195_v46  ;;  %v141_v46 = vld [vmem:[%s6396_s1 + $0x258] sm:$0xff]  ;;  %v4245_v48 = vpack.c.bf16 %v100_v42, %v80_v40  ;;  %v240_v33 = vld [vmem:[%s6396_s1 + $0x570] sm:$0xff]  ;;  %v278_v42 = vld [vmem:[%s6396_s1 + $0x6a0] sm:$0xff] }
  0x5c   : > { %v260_v34 = vld [vmem:[%s6396_s1 + $0x610] sm:$0xff]  ;;  %v301_v40 = vld [vmem:[%s6396_s1 + $0x758] sm:$0xff]  ;;  %v4233_v56 = vpack.c.bf16 %v298_v43, %v278_v42 }
  0x5d   : > { %4166 = vmatpush1.bf16.msra.mxu0 %v4165_v52  ;;  %v120_v52 = vld [vmem:[%s6396_s1 + $0x1b0] sm:$0xff] }
  0x5e   : > { %4198 = vmatpush1.bf16.msra.mxu1 %v4197_v53  ;;  %4168 = vmatprep.subr.bf16.mxu0 %v4167_v54  ;;  %v4247_v53 = vpack.c.bf16 %v141_v46, %v121_v45  ;;  %v140_v54 = vld [vmem:[%s6396_s1 + $0x250] sm:$0xff] }
  0x5f   : > { %4200 = vmatprep.subr.bf16.mxu1 %v4199_v58  ;;  %v181_v58 = vld [vmem:[%s6396_s1 + $0x398] sm:$0xff]  ;;  %v4249_v60 = vpack.c.bf16 %v140_v54, %v120_v52  ;;  %v280_v45 = vld [vmem:[%s6396_s1 + $0x6b0] sm:$0xff]  ;;  %v318_v54 = vld [vmem:[%s6396_s1 + $0x7e0] sm:$0xff] }
  0x60   : > { %v300_v46 = vld [vmem:[%s6396_s1 + $0x750] sm:$0xff]  ;;  %v341_v52 = vld [vmem:[%s6396_s1 + $0x898] sm:$0xff]  ;;  %v4237_v14 = vpack.c.bf16 %v338_v55, %v318_v54  ;;  %v203_v54 = vld [vmem:[%s6396_s1 + $0x448] sm:$0xff] }
  0x61   : > { %4170 = vmatpush1.bf16.msra.mxu0 %v4169_v1  ;;  %v160_v1 = vld [vmem:[%s6396_s1 + $0x2f0] sm:$0xff]  ;;  %v223_v55 = vld [vmem:[%s6396_s1 + $0x4e8] sm:$0xff] }
  0x62   : > { %4202 = vmatpush1.bf16.msra.mxu1 %v4201_v10  ;;  %4172 = vmatprep.subr.bf16.mxu0 %v4171_v11  ;;  %v4251_v10 = vpack.c.bf16 %v181_v58, %v161_v57  ;;  %v180_v11 = vld [vmem:[%s6396_s1 + $0x390] sm:$0xff] }
  0x63   : > { %4204 = vmatprep.subr.bf16.mxu1 %v4203_v16  ;;  %v221_v16 = vld [vmem:[%s6396_s1 + $0x4d8] sm:$0xff]  ;;  %v4253_v21 = vpack.c.bf16 %v180_v11, %v160_v1  ;;  %v320_v57 = vld [vmem:[%s6396_s1 + $0x7f0] sm:$0xff]  ;;  %v4267_v1 = vpack.c.bf16 %v341_v52, %v321_v51  ;;  %v358_v11 = vld [vmem:[%s6396_s1 + $0x920] sm:$0xff] }
  0x64   : > { %v4255_v26 = vpack.c.bf16 %v221_v16, %v201_v15  ;;  %v340_v58 = vld [vmem:[%s6396_s1 + $0x890] sm:$0xff] }
  0x65   : > { %4174 = vmatpush1.bf16.msra.mxu0 %v4173_v23  ;;  %v200_v23 = vld [vmem:[%s6396_s1 + $0x430] sm:$0xff]  ;;  %v4269_v20 = vpack.c.bf16 %v340_v58, %v320_v57  ;;  %v205_v57 = vld [vmem:[%s6396_s1 + $0x458] sm:$0xff] }
  0x66   : > { %4206 = vmatpush1.bf16.msra.mxu1 %v4205_v24  ;;  %4176 = vmatprep.subr.bf16.mxu0 %v4175_v25  ;;  %v220_v24 = vld [vmem:[%s6396_s1 + $0x4d0] sm:$0xff]  ;;  %v239_v25 = vld [vmem:[%s6396_s1 + $0x568] sm:$0xff]  ;;  %v225_v58 = vld [vmem:[%s6396_s1 + $0x4f8] sm:$0xff] }
  0x67   : > { %4208 = vmatprep.subr.bf16.mxu1 %v4207_v29  ;;  %v261_v29 = vld [vmem:[%s6396_s1 + $0x618] sm:$0xff]  ;;  %v4227_v38 = vpack.c.bf16 %v259_v27, %v239_v25  ;;  %v360_v15 = vld [vmem:[%s6396_s1 + $0x930] sm:$0xff]  ;;  %v82_v25 = vld [vmem:[%s6396_s1 + $0x80] sm:$0xff]  ;;  %v4241_v27 = vpack.c.bf16 %v378_v13, %v358_v11 }
  0x68   : > { %v380_v16 = vld [vmem:[%s6396_s1 + $0x9d0] sm:$0xff]  ;;  %v263_v11 = vld [vmem:[%s6396_s1 + $0x628] sm:$0xff] }
  0x69   : > { %4178 = vmatpush1.bf16.msra.mxu0 %v4177_v35  ;;  %v279_v35 = vld [vmem:[%s6396_s1 + $0x6a8] sm:$0xff]  ;;  %v124_v42 = vld [vmem:[%s6396_s1 + $0x1d0] sm:$0xff] }
  0x6a   : > { %4210 = vmatpush1.bf16.msra.mxu1 %v4209_v36  ;;  %4212 = vmatprep.subr.bf16.mxu0 %v4211_v37  ;;  %v299_v36 = vld [vmem:[%s6396_s1 + $0x748] sm:$0xff]  ;;  %v4257_v37 = vpack.c.bf16 %v220_v24, %v200_v23  ;;  %v105_v23 = vld [vmem:[%s6396_s1 + $0x138] sm:$0xff]  ;;  %v144_v43 = vld [vmem:[%s6396_s1 + $0x270] sm:$0xff] }
  0x6b   : > { %4244 = vmatprep.subr.bf16.mxu1 %v4243_v41  ;;  %v4259_v41 = vpack.c.bf16 %v261_v29, %v241_v28  ;;  %v4231_v50 = vpack.c.bf16 %v299_v36, %v279_v35  ;;  %v84_v28 = vld [vmem:[%s6396_s1 + $0x90] sm:$0xff]  ;;  %v145_v35 = vld [vmem:[%s6396_s1 + $0x278] sm:$0xff] }
  0x6c   : > { %838 = vmatmul.mubr.f32.vlgmr.msra.gmra.mrb[4].mxu0 %v4906_v12  ;;  %v104_v29 = vld [vmem:[%s6396_s1 + $0x130] sm:$0xff] }
  0x6d   : > { %909 = vmatmul.mubr.f32.vlgmr.msra.gmra.mrb[4].mxu1 %v4906_v12  ;;  %4214 = vmatpush1.bf16.msra.mxu0 %v4213_v47  ;;  %v319_v47 = vld [vmem:[%s6396_s1 + $0x7e8] sm:$0xff]  ;;  %v164_v52 = vld [vmem:[%s6396_s1 + $0x310] sm:$0xff] }
  0x6e   : > { %4246 = vmatpush1.bf16.msra.mxu1 %v4245_v48  ;;  %4216 = vmatprep.subr.bf16.mxu0 %v4215_v49  ;;  %v339_v48 = vld [vmem:[%s6396_s1 + $0x888] sm:$0xff]  ;;  %v4261_v49 = vpack.c.bf16 %v260_v34, %v240_v33  ;;  %v125_v34 = vld [vmem:[%s6396_s1 + $0x1d8] sm:$0xff] }
  0x6f   : > { %4248 = vmatprep.subr.bf16.mxu1 %v4247_v53  ;;  %979 = vmatprep.mubr.f32.mxu0 %v4562_v17  ;;  %v4263_v53 = vpack.c.bf16 %v301_v40, %v281_v39  ;;  %v4235_v62 = vpack.c.bf16 %v339_v48, %v319_v47  ;;  %v4309_v39 = vpack.c.bf16 %v104_v29, %v84_v28  ;;  %v165_v47 = vld [vmem:[%s6396_s1 + $0x318] sm:$0xff] }
  0x70   : > { %1050 = vmatprep.mubr.f32.mxu1 %v4562_v17  ;;  %v4279_v40 = vpack.c.bf16 %v143_v31, %v123_v30  ;;  %v185_v48 = vld [vmem:[%s6396_s1 + $0x3b8] sm:$0xff]  ;;  %v282_v31 = vld [vmem:[%s6396_s1 + $0x6c0] sm:$0xff] }
  0x71   : > { %4218 = vmatpush1.bf16.msra.mxu0 %v4217_v59  ;;  %v359_v59 = vld [vmem:[%s6396_s1 + $0x928] sm:$0xff]  ;;  %v285_v28 = vld [vmem:[%s6396_s1 + $0x6d8] sm:$0xff] }
  0x72   : > { %4250 = vmatpush1.bf16.msra.mxu1 %v4249_v60  ;;  %4220 = vmatprep.subr.bf16.mxu0 %v4219_v61  ;;  %v379_v60 = vld [vmem:[%s6396_s1 + $0x9c8] sm:$0xff]  ;;  %v4265_v61 = vpack.c.bf16 %v300_v46, %v280_v45  ;;  %v305_v29 = vld [vmem:[%s6396_s1 + $0x778] sm:$0xff] }
  0x73   : > { %4252 = vmatprep.subr.bf16.mxu1 %v4251_v10  ;;  %v381_v10 = vld [vmem:[%s6396_s1 + $0x9d8] sm:$0xff]  ;;  %v163_v45 = vld [vmem:[%s6396_s1 + $0x308] sm:$0xff] }
  0x74   : > { %v4271_v24 = vpack.c.bf16 %v381_v10, %v361_v63  ;;  %v183_v46 = vld [vmem:[%s6396_s1 + $0x3a8] sm:$0xff]  ;;  %v204_v63 = vld [vmem:[%s6396_s1 + $0x450] sm:$0xff] }
  0x75   : > { %4222 = vmatpush1.bf16.msra.mxu0 %v4221_v18  ;;  %v83_v18 = vld [vmem:[%s6396_s1 + $0x88] sm:$0xff] }
  0x76   : > { %4254 = vmatpush1.bf16.msra.mxu1 %v4253_v21  ;;  %4224 = vmatprep.subr.bf16.mxu0 %v4223_v22  ;;  %v4239_v21 = vpack.c.bf16 %v379_v60, %v359_v59  ;;  %v85_v22 = vld [vmem:[%s6396_s1 + $0x98] sm:$0xff]  ;;  %v4275_v33 = vpack.c.bf16 %v103_v19, %v83_v18  ;;  %v4315_v59 = vpack.c.bf16 %v185_v48, %v165_v47  ;;  %v202_v60 = vld [vmem:[%s6396_s1 + $0x440] sm:$0xff]  ;;  %v243_v10 = vld [vmem:[%s6396_s1 + $0x588] sm:$0xff] }
  0x77   : > { %4256 = vmatprep.subr.bf16.mxu1 %v4255_v26  ;;  %v102_v26 = vld [vmem:[%s6396_s1 + $0x120] sm:$0xff]  ;;  %v4307_v36 = vpack.c.bf16 %v105_v23, %v85_v22  ;;  %v4319_v18 = vpack.c.bf16 %v225_v58, %v205_v57  ;;  %v244_v22 = vld [vmem:[%s6396_s1 + $0x590] sm:$0xff]  ;;  %v363_v48 = vld [vmem:[%s6396_s1 + $0x948] sm:$0xff] }
  0x78   : > { %v242_v19 = vld [vmem:[%s6396_s1 + $0x580] sm:$0xff]  ;;  %v264_v23 = vld [vmem:[%s6396_s1 + $0x630] sm:$0xff] }
  0x79   : > { %4226 = vmatpush1.bf16.msra.mxu0 %v4225_v32  ;;  %v4273_v32 = vpack.c.bf16 %v380_v16, %v360_v15  ;;  %v245_v15 = vld [vmem:[%s6396_s1 + $0x598] sm:$0xff]  ;;  %v344_v47 = vld [vmem:[%s6396_s1 + $0x8b0] sm:$0xff] }
  0x7a   : > { %4258 = vmatpush1.bf16.msra.mxu1 %v4257_v37  ;;  %4228 = vmatprep.subr.bf16.mxu0 %v4227_v38  ;;  %v122_v37 = vld [vmem:[%s6396_s1 + $0x1c0] sm:$0xff]  ;;  %v4277_v38 = vpack.c.bf16 %v102_v26, %v82_v25  ;;  %v265_v16 = vld [vmem:[%s6396_s1 + $0x638] sm:$0xff]  ;;  %v303_v25 = vld [vmem:[%s6396_s1 + $0x768] sm:$0xff] }
  0x7b   : > { %4260 = vmatprep.subr.bf16.mxu1 %v4259_v41  ;;  %v142_v41 = vld [vmem:[%s6396_s1 + $0x260] sm:$0xff]  ;;  %v4323_v30 = vpack.c.bf16 %v265_v16, %v245_v15  ;;  %v364_v57 = vld [vmem:[%s6396_s1 + $0x950] sm:$0xff]  ;;  %v4357_v15 = vld [vmem:[%s6398_s3 + $0xc8] sm:$0xff]  }
  0x7c   : > { %v4281_v51 = vpack.c.bf16 %v142_v41, %v122_v37  ;;  %v343_v37 = vld [vmem:[%s6396_s1 + $0x8a8] sm:$0xff]  ;;  %v345_v41 = vld [vmem:[%s6396_s1 + $0x8b8] sm:$0xff]  ;;  %v384_v58 = vld [vmem:[%s6396_s1 + $0x9f0] sm:$0xff] }
  0x7d   : > { %4230 = vmatpush1.bf16.msra.mxu0 %v4229_v44  ;;  %v4311_v44 = vpack.c.bf16 %v145_v35, %v125_v34  ;;  %v284_v34 = vld [vmem:[%s6396_s1 + $0x6d0] sm:$0xff]  ;;  %v4552_v16 = vld [vmem:[%s4879_s15] sm:$0x1] }
  0x7e   : > { %4262 = vmatpush1.bf16.msra.mxu1 %v4261_v49  ;;  %4232 = vmatprep.subr.bf16.mxu0 %v4231_v50  ;;  %v162_v49 = vld [vmem:[%s6396_s1 + $0x300] sm:$0xff]  ;;  %v304_v35 = vld [vmem:[%s6396_s1 + $0x770] sm:$0xff] }
  0x7f   : > { %4264 = vmatprep.subr.bf16.mxu1 %v4263_v53  ;;  %v182_v50 = vld [vmem:[%s6396_s1 + $0x3a0] sm:$0xff]  ;;  %v184_v53 = vld [vmem:[%s6396_s1 + $0x3b0] sm:$0xff] }
  0x80   : > { %v4317_v13 = vpack.c.bf16 %v184_v53, %v164_v52  ;;  %v365_v52 = vld [vmem:[%s6396_s1 + $0x958] sm:$0xff] }
  0x81   : > { %4234 = vmatpush1.bf16.msra.mxu0 %v4233_v56  ;;  %v4283_v56 = vpack.c.bf16 %v183_v46, %v163_v45  ;;  %v324_v46 = vld [vmem:[%s6396_s1 + $0x810] sm:$0xff]  ;;  %v385_v53 = vld [vmem:[%s6396_s1 + $0x9f8] sm:$0xff] }
  0x82   : > { %4266 = vmatpush1.bf16.msra.mxu1 %v4265_v61  ;;  %4236 = vmatprep.subr.bf16.mxu0 %v4235_v62  ;;  %v222_v61 = vld [vmem:[%s6396_s1 + $0x4e0] sm:$0xff]  ;;  %v4285_v62 = vpack.c.bf16 %v182_v50, %v162_v49  ;;  %v383_v49 = vld [vmem:[%s6396_s1 + $0x9e8] sm:$0xff]  ;;  %v4329_v50 = vpack.c.bf16 %v304_v35, %v284_v34 }
  0x83   : > { %4268 = vmatprep.subr.bf16.mxu1 %v4267_v1  ;;  %v224_v1 = vld [vmem:[%s6396_s1 + $0x4f0] sm:$0xff]  ;;  %v4374_v34 = vld [vmem:[%s6398_s3 + $0x28] sm:$0xff]  }
  0x84   : > { %v4321_v26 = vpack.c.bf16 %v224_v1, %v204_v63  ;;  %v4337_v63 = vpack.c.bf16 %v384_v58, %v364_v57  ;;  %v4352_v1 = vld [vmem:[%s6398_s3 + $0x40] sm:$0xff]   ;;  %v4375_v35 = vld [vmem:[%s6398_s3 + $0xa8] sm:$0xff]  }
  0x85   : > { %4238 = vmatpush1.bf16.msra.mxu0 %v4237_v14  ;;  %v4287_v14 = vpack.c.bf16 %v223_v55, %v203_v54  ;;  %v362_v55 = vld [vmem:[%s6396_s1 + $0x940] sm:$0xff] }
  0x86   : > { %4270 = vmatpush1.bf16.msra.mxu1 %v4269_v20  ;;  %4240 = vmatprep.subr.bf16.mxu0 %v4239_v21  ;;  %v262_v20 = vld [vmem:[%s6396_s1 + $0x620] sm:$0xff]  ;;  %v4289_v21 = vpack.c.bf16 %v222_v61, %v202_v60  ;;  %v4303_v60 = vpack.c.bf16 %v383_v49, %v363_v48  ;;  %v4335_v61 = vpack.c.bf16 %v385_v53, %v365_v52  ;;  %v4563_v48 = vmov 1966171168  }
  0x87   : > { %4272 = vmatprep.subr.bf16.mxu1 %v4271_v24  ;;  %v283_v24 = vld [vmem:[%s6396_s1 + $0x6c8] sm:$0xff]  ;;  %v1239_v49 = vunpack.c.l.s4 %v4563_v48 }
  0x89   : > { %4242 = vmatpush1.bf16.msra.mxu0 %v4241_v27  ;;  %v4291_v27 = vpack.c.bf16 %v263_v11, %v243_v10  ;;  %v4353_v10 = vld [vmem:[%s6398_s3 + $0xc0] sm:$0xff]  }
  0x8a   : > { %4274 = vmatpush1.bf16.msra.mxu1 %v4273_v32  ;;  %4276 = vmatprep.subr.bf16.mxu0 %v4275_v33  ;;  %v302_v32 = vld [vmem:[%s6396_s1 + $0x760] sm:$0xff]  ;;  %v4293_v33 = vpack.c.bf16 %v262_v20, %v242_v19  ;;  %v4359_v19 = vld [vmem:[%s6398_s3 + $0x88] sm:$0xff]   ;;  %v4360_v20 = vld [vmem:[%s6398_s3 + $0x50] sm:$0xff]  }
  0x8b   : > { %4308 = vmatprep.subr.bf16.mxu1 %v4307_v36  ;;  %v323_v36 = vld [vmem:[%s6396_s1 + $0x808] sm:$0xff]  ;;  %v4297_v45 = vpack.c.bf16 %v302_v32, %v282_v31  ;;  %v4354_v11 = vld [vmem:[%s6398_s3] sm:$0xff]  }
  0x8c   : > { %980 = vmatmul.mubr.f32.vlgmr.msra.gmra.mrb[6].mxu0 %v4906_v12  ;;  %v4371_v31 = vld [vmem:[%s6398_s3 + $0xa0] sm:$0xff]   ;;  %v4372_v32 = vld [vmem:[%s6398_s3 + $0x68] sm:$0xff]  }
  0x8d   : > { %1051 = vmatmul.mubr.f32.vlgmr.msra.gmra.mrb[6].mxu1 %v4906_v12  ;;  %4278 = vmatpush1.bf16.msra.mxu0 %v4277_v38  ;;  %v4313_v12 = vpack.c.bf16 %v144_v43, %v124_v42  ;;  %v4325_v38 = vpack.c.bf16 %v264_v23, %v244_v22  ;;  %v4327_v42 = vpack.c.bf16 %v305_v29, %v285_v28  ;;  %v322_v43 = vld [vmem:[%s6396_s1 + $0x800] sm:$0xff]  ;;  %v4362_v22 = vld [vmem:[%s6398_s3 + $0x10] sm:$0xff]  }
  0x8e   : > { %4310 = vmatpush1.bf16.msra.mxu1 %v4309_v39  ;;  %4280 = vmatprep.subr.bf16.mxu0 %v4279_v40  ;;  %v4295_v39 = vpack.c.bf16 %v303_v25, %v283_v24  ;;  %v325_v40 = vld [vmem:[%s6396_s1 + $0x818] sm:$0xff]  ;;  %v4363_v23 = vld [vmem:[%s6398_s3 + $0x90] sm:$0xff]   ;;  %v4368_v28 = vld [vmem:[%s6398_s3 + $0x60] sm:$0xff]  }
  0x8f   : > { %4312 = vmatprep.subr.bf16.mxu1 %v4311_v44  ;;  %1121 = vmatprep.mubr.f32.mxu0 %v4562_v17  ;;  %v342_v44 = vld [vmem:[%s6396_s1 + $0x8a0] sm:$0xff]  ;;  %v4331_v54 = vpack.c.bf16 %v345_v41, %v325_v40  ;;  %v4364_v24 = vld [vmem:[%s6398_s3 + $0x58] sm:$0xff]  }
  0x90   : > { %1192 = vmatprep.mubr.f32.mxu1 %v4562_v17  ;;  %v4365_v25 = vld [vmem:[%s6398_s3 + $0xd8] sm:$0xff]   ;;  %v4369_v29 = vld [vmem:[%s6398_s3 + $0xe0] sm:$0xff]  }
  0x91   : > { %4282 = vmatpush1.bf16.msra.mxu0 %v4281_v51  ;;  %v4299_v51 = vpack.c.bf16 %v343_v37, %v323_v36  ;;  %v4376_v36 = vld [vmem:[%s6398_s3 + $0x70] sm:$0xff]   ;;  %v4380_v40 = vld [vmem:[%s6398_s3 + $0x78] sm:$0xff]  }
  0x92   : > { %4314 = vmatpush1.bf16.msra.mxu1 %v4313_v12  ;;  %4284 = vmatprep.subr.bf16.mxu0 %v4283_v56  ;;  %v382_v12 = vld [vmem:[%s6396_s1 + $0x9e0] sm:$0xff]  ;;  %v4301_v56 = vpack.c.bf16 %v342_v44, %v322_v43  ;;  %v4377_v37 = vld [vmem:[%s6398_s3 + $0xf0] sm:$0xff]   ;;  %v4381_v41 = vld [vmem:[%s6398_s3 + $0xf8] sm:$0xff]  }
  0x93   : > { %4316 = vmatprep.subr.bf16.mxu1 %v4315_v59  ;;  %v4333_v59 = vpack.c.bf16 %v344_v47, %v324_v46  ;;  %v4383_v43 = vld [vmem:[%s6398_s3 + $0xb8] sm:$0xff]   ;;  %v4384_v44 = vld [vmem:[%s6398_s3 + $0x140] sm:$0xff]   ;;  %v390_v46 = vshrl.u32 %v35_v0, 7 }
  0x95   : > { %4286 = vmatpush1.bf16.msra.mxu0 %v4285_v62  ;;  %v4305_v62 = vpack.c.bf16 %v382_v12, %v362_v55  ;;  %v5760_v47 = vsub.s32 0, %v390_v46  ;;  %v5766_v52 = vsub.s32 3, %v390_v46 }
  0x96   : > { %4318 = vmatpush1.bf16.msra.mxu1 %v4317_v13  ;;  %4288 = vmatprep.subr.bf16.mxu0 %v4287_v14  ;;  %v4355_v13 = vld [vmem:[%s6398_s3 + $0x80] sm:$0xff]   ;;  %v4356_v14 = vld [vmem:[%s6398_s3 + $0x48] sm:$0xff]  }
  0x97   : > { %4320 = vmatprep.subr.bf16.mxu1 %v4319_v18  ;;  %v4358_v18 = vld [vmem:[%s6398_s3 + $0x8] sm:$0xff]   ;;  %v392_v53 = vrot.slane %v4619_v2, %v5760_v47 }
  0x99   : > { %4290 = vmatpush1.bf16.msra.mxu0 %v4289_v21  ;;  %v4361_v21 = vld [vmem:[%s6398_s3 + $0xd0] sm:$0xff]  }
  0x9a   : > { %4322 = vmatpush1.bf16.msra.mxu1 %v4321_v26  ;;  %4292 = vmatprep.subr.bf16.mxu0 %v4291_v27  ;;  %v4366_v26 = vld [vmem:[%s6398_s3 + $0x18] sm:$0xff]  }
  0x9b   : > { %4324 = vmatprep.subr.bf16.mxu1 %v4323_v30  ;;  %v4367_v27 = vld [vmem:[%s6398_s3 + $0x98] sm:$0xff]   ;;  %v4370_v30 = vld [vmem:[%s6398_s3 + $0x20] sm:$0xff]  }
  0x9d   : > { %4294 = vmatpush1.bf16.msra.mxu0 %v4293_v33  ;;  %v4373_v33 = vld [vmem:[%s6398_s3 + $0xe8] sm:$0xff]  }
  0x9e   : > { %4326 = vmatpush1.bf16.msra.mxu1 %v4325_v38  ;;  %4296 = vmatprep.subr.bf16.mxu0 %v4295_v39  ;;  %v4378_v38 = vld [vmem:[%s6398_s3 + $0x30] sm:$0xff]  }
  0x9f   : > { %4328 = vmatprep.subr.bf16.mxu1 %v4327_v42  ;;  %v4379_v39 = vld [vmem:[%s6398_s3 + $0xb0] sm:$0xff]   ;;  %v4382_v42 = vld [vmem:[%s6398_s3 + $0x38] sm:$0xff]  }
  0xa1   : > { %4298 = vmatpush1.bf16.msra.mxu0 %v4297_v45  ;;  %v4385_v45 = vld [vmem:[%s6398_s3 + $0x1c0] sm:$0xff]  }
  0xa2   : > { %4330 = vmatpush1.bf16.msra.mxu1 %v4329_v50  ;;  %4300 = vmatprep.subr.bf16.mxu0 %v4299_v51  ;;  %v5762_v50 = vsub.s32 2, %v390_v46  ;;  %v5764_v51 = vsub.s32 1, %v390_v46 }
  0xa3   : > { %4332 = vmatprep.subr.bf16.mxu1 %v4331_v54  ;;  %v1240_v54 = vunpack.c.0.s8 %v1239_v49 }
  0xa4   : > { %v400_v55 = vrot.slane %v4619_v2, %v5762_v50  ;;  %v396_v12 = vrot.slane %v4619_v2, %v5764_v51 }
  0xa5   : > { %4302 = vmatpush1.bf16.msra.mxu0 %v4301_v56  ;;  %v404_v56 = vrot.slane %v4619_v2, %v5766_v52 }
  0xa6   : > { %4334 = vmatpush1.bf16.msra.mxu1 %v4333_v59  ;;  %4304 = vmatprep.subr.bf16.mxu0 %v4303_v60 }
  0xa7   : > { %4336 = vmatprep.subr.bf16.mxu1 %v4335_v61  ;;  %v5776_v61 = vsub.s32 %v1240_v54, %v390_v46 }
  0xa9   : > { %4306 = vmatpush1.bf16.msra.mxu0 %v4305_v62 }
  0xaa   : > { %4338 = vmatpush1.bf16.msra.mxu1 %v4337_v63  ;;  %3777 = vmatprep.subr.bf16.mxu0 %v4352_v1 }
  0xab   : > { %3799 = vmatprep.subr.bf16.mxu1 %v4353_v10 }
  0xac   : > { %1122 = vmatmul.mubr.f32.vlgmr.msra.gmra.mrb[8].mxu0 %v4552_v16 }
  0xad   : > { %1193 = vmatmul.mubr.f32.vlgmr.msra.gmra.mrb[8].mxu1 %v4552_v16  ;;  %3778 = vmatpush3.bf16.msra.mxu0 %v4354_v11 }
  0xae   : > { %3800 = vmatpush3.bf16.msra.mxu1 %v4355_v13  ;;  %3779 = vmatprep.subr.bf16.mxu0 %v4356_v14 }
  0xaf   : > { %3801 = vmatprep.subr.bf16.mxu1 %v4357_v15 }
  0xb1   : > { %3780 = vmatpush3.bf16.msra.mxu0 %v4358_v18  ;;  %v5780_v18 = vsub.s32 4, %v390_v46 }
  0xb2   : > { %3802 = vmatpush3.bf16.msra.mxu1 %v4359_v19  ;;  %3781 = vmatprep.subr.bf16.mxu0 %v4360_v20  ;;  %v5782_v19 = vsub.s32 6, %v390_v46  ;;  %v5784_v20 = vsub.s32 5, %v390_v46 }
  0xb3   : > { %3803 = vmatprep.subr.bf16.mxu1 %v4361_v21  ;;  %v5786_v21 = vsub.s32 7, %v390_v46 }
  0xb5   : > { %3782 = vmatpush3.bf16.msra.mxu0 %v4362_v22  ;;  %v408_v22 = vrot.slane %v4619_v2, %v5780_v18 }
  0xb6   : > { %3804 = vmatpush3.bf16.msra.mxu1 %v4363_v23  ;;  %3783 = vmatprep.subr.bf16.mxu0 %v4364_v24  ;;  %v416_v23 = vrot.slane %v4619_v2, %v5782_v19  ;;  %v412_v24 = vrot.slane %v4619_v2, %v5784_v20 }
  0xb7   : > { %3805 = vmatprep.subr.bf16.mxu1 %v4365_v25  ;;  %v420_v25 = vrot.slane %v4619_v2, %v5786_v21 }
  0xb9   : > { %3784 = vmatpush3.bf16.msra.mxu0 %v4366_v26 }
  0xba   : > { %3806 = vmatpush3.bf16.msra.mxu1 %v4367_v27  ;;  %3785 = vmatprep.subr.bf16.mxu0 %v4368_v28 }
  0xbb   : > { %3807 = vmatprep.subr.bf16.mxu1 %v4369_v29 }
  0xbd   : > { %3786 = vmatpush3.bf16.msra.mxu0 %v4370_v30 }
  0xbe   : > { %3808 = vmatpush3.bf16.msra.mxu1 %v4371_v31  ;;  %3787 = vmatprep.subr.bf16.mxu0 %v4372_v32 }
  0xbf   : > { %3809 = vmatprep.subr.bf16.mxu1 %v4373_v33 }
  0xc1   : > { %3788 = vmatpush3.bf16.msra.mxu0 %v4374_v34 }
  0xc2   : > { %3810 = vmatpush3.bf16.msra.mxu1 %v4375_v35  ;;  %3789 = vmatprep.subr.bf16.mxu0 %v4376_v36  ;;  %v1199_v35 = vld [vmem:[#allocation2] sm:$0xff]  ;;  %v1205_v36 = vld [vmem:[#allocation3] sm:$0xff] }
  0xc3   : > { %3811 = vmatprep.subr.bf16.mxu1 %v4377_v37 }
  0xc5   : > { %3790 = vmatpush3.bf16.msra.mxu0 %v4378_v38 }
  0xc6   : > { %3812 = vmatpush3.bf16.msra.mxu1 %v4379_v39  ;;  %3791 = vmatprep.subr.bf16.mxu0 %v4380_v40  ;;  %v1202_v39 = vmul.f32 0.2, %v1199_v35  ;;  %v1208_v40 = vsub.f32 1.0, %v1205_v36  ;;  %v4398_v36 = vld [vmem:[%s6398_s3 + $0x118] sm:$0xff]  }
  0xc7   : > { %3813 = vmatprep.subr.bf16.mxu1 %v4381_v41 }
  0xc9   : > { %3792 = vmatpush3.bf16.msra.mxu0 %v4382_v42 }
  0xca   : > { %3814 = vmatpush3.bf16.msra.mxu1 %v4383_v43  ;;  %3821 = vmatprep.subr.bf16.mxu0 %v4384_v44  ;;  %v1211_v44 = vmul.f32 %v1208_v40, %v1202_v39 }
  0xcb   : > { %3843 = vmatprep.subr.bf16.mxu1 %v4385_v45 }
  0xff   : > { %v555_v57 = vpop.f32.mrb[0].mxu0 }
 0x100   : > { %v556_v58 = vadd.f32 %v555_v57, %v392_v53  ;;  %v626_v59 = vpop.f32.mrb[0].mxu1  ;;  %v557_v60 = vpop.f32.mrb[1].mxu0 }
 0x101   : > { %v627_v62 = vadd.f32 %v626_v59, %v400_v55  ;;  %v558_v63 = vadd.f32 %v557_v60, %v396_v12  ;;  %v628_v1 = vpop.f32.mrb[1].mxu1 }
 0x102   : > { %v629_v10 = vadd.f32 %v628_v1, %v404_v56  ;;  %v4387_v1 = vld [vmem:[%s6398_s3 + $0x180] sm:$0xff]  }
 0x103   : > { %v1234_v11 = vcombine.low %v556_v58, %v558_v63  ;;  %v4386_v63 = vld [vmem:[%s6398_s3 + $0x100] sm:$0xff]  }
 0x104   : > { %v1235_v13 = vcombine.low %v627_v62, %v629_v10  ;;  %v4388_v10 = vld [vmem:[%s6398_s3 + $0x148] sm:$0xff]  }
 0x105   : > { %v1244_v14 = vrot.slane %v1234_v11, %v5776_v61  ;;  %v4389_v11 = vld [vmem:[%s6398_s3 + $0x1c8] sm:$0xff]  }
 0x106   : > { %v1251_v15 = vrot.slane %v1235_v13, %v5776_v61 }
 0x108   : > { %v1266_v16 = vcombine.low %v1244_v14, %v1251_v15  ;;  %v4390_v15 = vld [vmem:[%s6398_s3 + $0x108] sm:$0xff]  }
 0x10a   : > { %v1274_v43 = vrot.slane %v1266_v16, %v5776_v61  ;;  %v4391_v16 = vld [vmem:[%s6398_s3 + $0x188] sm:$0xff]  }
 0x11f   : > { %v697_v26 = vpop.f32.mrb[2].mxu0 }
 0x120   : > { %v698_v27 = vadd.f32 %v697_v26, %v408_v22  ;;  %v768_v28 = vpop.f32.mrb[2].mxu1  ;;  %v699_v29 = vpop.f32.mrb[3].mxu0  ;;  %v4392_v22 = vld [vmem:[%s6398_s3 + $0x150] sm:$0xff]   ;;  %v424_v26 = vrot.slane %v4624_v3, %v5760_v47 }
 0x121   : > { %v769_v30 = vadd.f32 %v768_v28, %v416_v23  ;;  %v700_v31 = vadd.f32 %v699_v29, %v412_v24  ;;  %v770_v32 = vpop.f32.mrb[3].mxu1  ;;  %v4393_v23 = vld [vmem:[%s6398_s3 + $0x1d0] sm:$0xff]   ;;  %v428_v28 = vrot.slane %v4624_v3, %v5764_v51  ;;  %v4396_v29 = vld [vmem:[%s6398_s3 + $0x158] sm:$0xff]  }
 0x122   : > { %v771_v33 = vadd.f32 %v770_v32, %v420_v25  ;;  %v4394_v24 = vld [vmem:[%s6398_s3 + $0x110] sm:$0xff]  }
 0x123   : > { %v1236_v34 = vcombine.low %v698_v27, %v700_v31  ;;  %v4395_v25 = vld [vmem:[%s6398_s3 + $0x190] sm:$0xff]   ;;  %v432_v27 = vrot.slane %v4624_v3, %v5762_v50  ;;  %v436_v31 = vrot.slane %v4624_v3, %v5766_v52 }
 0x124   : > { %v1237_v37 = vcombine.low %v769_v30, %v771_v33  ;;  %v4397_v30 = vld [vmem:[%s6398_s3 + $0x1d8] sm:$0xff]  }
 0x125   : > { %v1258_v38 = vrot.slane %v1236_v34, %v5776_v61 }
 0x126   : > { %v1265_v41 = vrot.slane %v1237_v37, %v5776_v61  ;;  %v4399_v37 = vld [vmem:[%s6398_s3 + $0x198] sm:$0xff]  }
 0x128   : > { %v1267_v42 = vcombine.low %v1258_v38, %v1265_v41  ;;  %v4400_v41 = vld [vmem:[%s6398_s3 + $0x160] sm:$0xff]  }
 0x12a   : > { %v1281_v45 = vrot.slane %v1267_v42, %v5776_v61  ;;  %v4401_v42 = vld [vmem:[%s6398_s3 + $0x1e0] sm:$0xff]  }
 0x12c   : > { %v1282_v46 = vcombine.low %v1274_v43, %v1281_v45 }
 0x12e   : > { %v1359_v48 = vadd.f32 %v1282_v46, %v1211_v44  ;;  %v4402_v46 = vld [vmem:[%s6398_s3 + $0x120] sm:$0xff]  }
 0x130   : > { %vm1362_vm2 = vcmp.gt.f32.partialorder %v1359_v48, 0.5  ;;  %1371 = vst [vmem:[#allocation2] sm:$0xff] %v1359_v48  ;;  %v4403_v48 = vld [vmem:[%s6398_s3 + $0x1a0] sm:$0xff]  }
 0x131   : > { %v5801_v49 = vsel %vm1362_vm2, 1.0, %v4562_v17 }
 0x132   : > { %1374 = vst [vmem:[#allocation3] sm:$0xff] %v5801_v49  ;;  %v1387_v53 = vrot.slane %v5801_v49, %v5764_v51  ;;  %v1395_v54 = vrot.slane %v5801_v49, %v5766_v52  ;;  %v1383_v55 = vrot.slane %v5801_v49, %v5760_v47  ;;  %v1391_v12 = vrot.slane %v5801_v49, %v5762_v50 }
 0x133   : > { %v1403_v56 = vrot.slane %v5801_v49, %v5784_v20  ;;  %v1411_v57 = vrot.slane %v5801_v49, %v5786_v21 }
 0x134   : > { %v1481_v58 = vpack.c.bf16 %v1387_v53, %v1387_v53  ;;  %v1483_v59 = vpack.c.bf16 %v1395_v54, %v1395_v54  ;;  %v1480_v60 = vpack.c.bf16 %v1383_v55, %v1383_v55  ;;  %v1482_v62 = vpack.c.bf16 %v1391_v12, %v1391_v12  ;;  %v4404_v54 = vld [vmem:[%s6398_s3 + $0x168] sm:$0xff]  }
 0x135   : > { %v1485_v13 = vpack.c.bf16 %v1403_v56, %v1403_v56  ;;  %v1487_v14 = vpack.c.bf16 %v1411_v57, %v1411_v57  ;;  %v4405_v55 = vld [vmem:[%s6398_s3 + $0x1e8] sm:$0xff]  }
 0x136   : > { %2812 = vmatprep.mubr.bf16.mxu0 %v1481_v58  ;;  %2852 = vmatprep.mubr.bf16.mxu1 %v1483_v59  ;;  %v4406_v57 = vld [vmem:[%s6398_s3 + $0x128] sm:$0xff]   ;;  %v4408_v59 = vld [vmem:[%s6398_s3 + $0x170] sm:$0xff]  }
 0x137   : > { %2813 = vmatmul.mubr.bf16.vlgmr.msra.gmra.mrb[12].mxu0 %v1480_v60  ;;  %2853 = vmatmul.mubr.bf16.vlgmr.msra.gmra.mrb[12].mxu1 %v1482_v62  ;;  %v4407_v58 = vld [vmem:[%s6398_s3 + $0x1a8] sm:$0xff]   ;;  %v4409_v60 = vld [vmem:[%s6398_s3 + $0x1f0] sm:$0xff]  }
 0x138   : > { %3822 = vmatpush3.bf16.msra.mxu0 %v4386_v63  ;;  %3844 = vmatpush3.bf16.msra.mxu1 %v4387_v1  ;;  %v4410_v62 = vld [vmem:[%s6398_s3 + $0x130] sm:$0xff]   ;;  %v4412_v1 = vld [vmem:[%s6398_s3 + $0x178] sm:$0xff]  }
 0x139   : > { %2892 = vmatprep.mubr.bf16.mxu0 %v1485_v13  ;;  %2932 = vmatprep.mubr.bf16.mxu1 %v1487_v14  ;;  %v4411_v63 = vld [vmem:[%s6398_s3 + $0x1b0] sm:$0xff]   ;;  %v4415_v13 = vld [vmem:[%s6398_s3 + $0x1b8] sm:$0xff]   ;;  %v1399_v14 = vrot.slane %v5801_v49, %v5780_v18 }
 0x13a   : > { %3823 = vmatprep.subr.bf16.mxu0 %v4388_v10  ;;  %3845 = vmatprep.subr.bf16.mxu1 %v4389_v11  ;;  %v4413_v10 = vld [vmem:[%s6398_s3 + $0x1f8] sm:$0xff]  }
 0x13b   : > { %v4414_v11 = vld [vmem:[%s6398_s3 + $0x138] sm:$0xff]  }
 0x13c   : > { %3824 = vmatpush3.bf16.msra.mxu0 %v4390_v15  ;;  %3846 = vmatpush3.bf16.msra.mxu1 %v4391_v16  ;;  %v1407_v15 = vrot.slane %v5801_v49, %v5782_v19  ;;  %v4416_v16 = vld [vmem:[%s6398_s3 + $0x240] sm:$0xff]  }
 0x13d   : > { %3825 = vmatprep.subr.bf16.mxu0 %v4392_v22  ;;  %3847 = vmatprep.subr.bf16.mxu1 %v4393_v23  ;;  %v4417_v22 = vld [vmem:[%s6398_s3 + $0x2c0] sm:$0xff]  }
 0x13e   : > { %v4418_v23 = vld [vmem:[%s6398_s3 + $0x200] sm:$0xff]   ;;  %v1486_v49 = vpack.c.bf16 %v1407_v15, %v1407_v15 }
 0x13f   : > { %v839_v32 = vpop.f32.mrb[4].mxu0 }
 0x140   : > { %3826 = vmatpush3.bf16.msra.mxu0 %v4394_v24  ;;  %3848 = vmatpush3.bf16.msra.mxu1 %v4395_v25  ;;  %v840_v33 = vadd.f32 %v839_v32, %v424_v26  ;;  %v910_v34 = vpop.f32.mrb[4].mxu1  ;;  %v841_v35 = vpop.f32.mrb[5].mxu0  ;;  %v4419_v24 = vld [vmem:[%s6398_s3 + $0x280] sm:$0xff]   ;;  %v1484_v25 = vpack.c.bf16 %v1399_v14, %v1399_v14  ;;  %v4420_v26 = vld [vmem:[%s6398_s3 + $0x248] sm:$0xff]   ;;  %v4426_v32 = vld [vmem:[%s6398_s3 + $0x210] sm:$0xff]  }
 0x141   : > { %v911_v38 = vadd.f32 %v910_v34, %v432_v27  ;;  %v842_v39 = vadd.f32 %v841_v35, %v428_v28  ;;  %v912_v40 = vpop.f32.mrb[5].mxu1  ;;  %3827 = vmatprep.subr.bf16.mxu0 %v4396_v29  ;;  %3849 = vmatprep.subr.bf16.mxu1 %v4397_v30  ;;  %v4421_v27 = vld [vmem:[%s6398_s3 + $0x2c8] sm:$0xff]   ;;  %v4424_v30 = vld [vmem:[%s6398_s3 + $0x250] sm:$0xff]   ;;  %v440_v34 = vrot.slane %v4624_v3, %v5780_v18 }
 0x142   : > { %v913_v43 = vadd.f32 %v912_v40, %v436_v31  ;;  %v4422_v28 = vld [vmem:[%s6398_s3 + $0x208] sm:$0xff]   ;;  %v4425_v31 = vld [vmem:[%s6398_s3 + $0x2d0] sm:$0xff]   ;;  %v448_v35 = vrot.slane %v4624_v3, %v5782_v19 }
 0x143   : > { %v1283_v44 = vcombine.low %v840_v33, %v842_v39  ;;  %v4423_v29 = vld [vmem:[%s6398_s3 + $0x288] sm:$0xff]   ;;  %v4427_v33 = vld [vmem:[%s6398_s3 + $0x290] sm:$0xff]   ;;  %v452_v39 = vrot.slane %v4624_v3, %v5786_v21 }
 0x144   : > { %v1284_v45 = vcombine.low %v911_v38, %v913_v43  ;;  %3828 = vmatpush3.bf16.msra.mxu0 %v4398_v36  ;;  %3850 = vmatpush3.bf16.msra.mxu1 %v4399_v37  ;;  %v444_v36 = vrot.slane %v4624_v3, %v5784_v20  ;;  %v4428_v37 = vld [vmem:[%s6398_s3 + $0x258] sm:$0xff]   ;;  %v4437_v14 = vld [vmem:[%s6398_s3 + $0x2e8] sm:$0xff]  }
 0x145   : > { %v5879_v53 = vrot.slane %v1283_v44, %v5776_v61  ;;  %3829 = vmatprep.subr.bf16.mxu0 %v4400_v41  ;;  %3851 = vmatprep.subr.bf16.mxu1 %v4401_v42  ;;  %v4429_v38 = vld [vmem:[%s6398_s3 + $0x2d8] sm:$0xff]  }
 0x146   : > { %v5888_v12 = vrot.slane %v1284_v45, %v5776_v61  ;;  %v4430_v44 = vld [vmem:[%s6398_s3 + $0x218] sm:$0xff]  }
 0x147   : > { %v4431_v45 = vld [vmem:[%s6398_s3 + $0x298] sm:$0xff]  }
 0x148   : > { %v1315_v56 = vcombine.low %v5879_v53, %v5888_v12  ;;  %3830 = vmatpush3.bf16.msra.mxu0 %v4402_v46  ;;  %3852 = vmatpush3.bf16.msra.mxu1 %v4403_v48  ;;  %v4444_v53 = vld [vmem:[%s6398_s3 + $0x278] sm:$0xff]  }
 0x149   : > { %3831 = vmatprep.subr.bf16.mxu0 %v4404_v54  ;;  %3853 = vmatprep.subr.bf16.mxu1 %v4405_v55  ;;  %v4432_v55 = vld [vmem:[%s6398_s3 + $0x260] sm:$0xff]   ;;  %v4445_v12 = vld [vmem:[%s6398_s3 + $0x2f8] sm:$0xff]  }
 0x14c   : > { %3832 = vmatpush3.bf16.msra.mxu0 %v4406_v57  ;;  %3854 = vmatpush3.bf16.msra.mxu1 %v4407_v58  ;;  %v4433_v57 = vld [vmem:[%s6398_s3 + $0x2e0] sm:$0xff]  }
 0x14d   : > { %3833 = vmatprep.subr.bf16.mxu0 %v4408_v59  ;;  %3855 = vmatprep.subr.bf16.mxu1 %v4409_v60  ;;  %v1200_v60 = vld [vmem:[#allocation2 + $0x8] sm:$0xff] }
 0x14e   : > { %v1203_v15 = vmul.f32 0.2, %v1200_v60  ;;  %v4455_v60 = vld [vmem:[%s6398_s3 + $0x388] sm:$0xff]  }
 0x150   : > { %3834 = vmatpush3.bf16.msra.mxu0 %v4410_v62  ;;  %3856 = vmatpush3.bf16.msra.mxu1 %v4411_v63  ;;  %v1206_v62 = vld [vmem:[#allocation3 + $0x8] sm:$0xff] }
 0x151   : > { %3835 = vmatprep.subr.bf16.mxu0 %v4412_v1  ;;  %3857 = vmatprep.subr.bf16.mxu1 %v4413_v10  ;;  %v4434_v1 = vld [vmem:[%s6398_s3 + $0x220] sm:$0xff]  }
 0x152   : > { %v4435_v10 = vld [vmem:[%s6398_s3 + $0x2a0] sm:$0xff]  }
 0x154   : > { %3836 = vmatpush3.bf16.msra.mxu0 %v4414_v11  ;;  %3858 = vmatpush3.bf16.msra.mxu1 %v4415_v13  ;;  %v4436_v13 = vld [vmem:[%s6398_s3 + $0x268] sm:$0xff]  }
 0x155   : > { %3865 = vmatprep.subr.bf16.mxu0 %v4416_v16  ;;  %3887 = vmatprep.subr.bf16.mxu1 %v4417_v22  ;;  %v1209_v16 = vsub.f32 1.0, %v1206_v62  ;;  %v4456_v62 = vld [vmem:[%s6398_s3 + $0x350] sm:$0xff]  }
 0x157   : > { %2893 = vmatmul.mubr.bf16.vlgmr.msra.gmra.mrb[16].mxu0 %v1484_v25  ;;  %2933 = vmatmul.mubr.bf16.vlgmr.msra.gmra.mrb[16].mxu1 %v1486_v49  ;;  %v4439_v25 = vld [vmem:[%s6398_s3 + $0x2a8] sm:$0xff]   ;;  %v4440_v49 = vld [vmem:[%s6398_s3 + $0x270] sm:$0xff]  }
 0x158   : > { %3866 = vmatpush3.bf16.msra.mxu0 %v4418_v23  ;;  %3888 = vmatpush3.bf16.msra.mxu1 %v4419_v24  ;;  %v4438_v24 = vld [vmem:[%s6398_s3 + $0x228] sm:$0xff]  }
 0x159   : > { %3867 = vmatprep.subr.bf16.mxu0 %v4420_v26  ;;  %3889 = vmatprep.subr.bf16.mxu1 %v4421_v27  ;;  %v4441_v26 = vld [vmem:[%s6398_s3 + $0x2f0] sm:$0xff]   ;;  %v1323_v27 = vrot.slane %v1315_v56, %v5776_v61 }
 0x15c   : > { %3868 = vmatpush3.bf16.msra.mxu0 %v4422_v28  ;;  %3890 = vmatpush3.bf16.msra.mxu1 %v4423_v29  ;;  %v1212_v28 = vmul.f32 %v1209_v16, %v1203_v15  ;;  %v464_v15 = vrot.slane %v4629_v4, %v5762_v50  ;;  %v460_v16 = vrot.slane %v4629_v4, %v5764_v51 }
 0x15d   : > { %3869 = vmatprep.subr.bf16.mxu0 %v4424_v30  ;;  %3891 = vmatprep.subr.bf16.mxu1 %v4425_v31  ;;  %v4442_v31 = vld [vmem:[%s6398_s3 + $0x230] sm:$0xff]  }
 0x15f   : > { %v981_v40 = vpop.f32.mrb[6].mxu0 }
 0x160   : > { %3870 = vmatpush3.bf16.msra.mxu0 %v4426_v32  ;;  %3892 = vmatpush3.bf16.msra.mxu1 %v4427_v33  ;;  %v982_v41 = vadd.f32 %v981_v40, %v440_v34  ;;  %v1052_v42 = vpop.f32.mrb[6].mxu1  ;;  %v983_v43 = vpop.f32.mrb[7].mxu0  ;;  %v4443_v32 = vld [vmem:[%s6398_s3 + $0x2b0] sm:$0xff]   ;;  %v4446_v33 = vld [vmem:[%s6398_s3 + $0x238] sm:$0xff]  }
 0x161   : > { %v1053_v46 = vadd.f32 %v1052_v42, %v448_v35  ;;  %v984_v48 = vadd.f32 %v983_v43, %v444_v36  ;;  %v1054_v54 = vpop.f32.mrb[7].mxu1  ;;  %3871 = vmatprep.subr.bf16.mxu0 %v4428_v37  ;;  %3893 = vmatprep.subr.bf16.mxu1 %v4429_v38  ;;  %v4447_v34 = vld [vmem:[%s6398_s3 + $0x2b8] sm:$0xff]   ;;  %v4448_v36 = vld [vmem:[%s6398_s3 + $0x340] sm:$0xff]  }
 0x162   : > { %v1055_v58 = vadd.f32 %v1054_v54, %v452_v39  ;;  %v4449_v37 = vld [vmem:[%s6398_s3 + $0x3c0] sm:$0xff]  }
 0x163   : > { %v1285_v59 = vcombine.low %v982_v41, %v984_v48  ;;  %v4450_v48 = vld [vmem:[%s6398_s3 + $0x300] sm:$0xff]  }
 0x164   : > { %v1286_v63 = vcombine.low %v1053_v46, %v1055_v58  ;;  %3872 = vmatpush3.bf16.msra.mxu0 %v4430_v44  ;;  %3894 = vmatpush3.bf16.msra.mxu1 %v4431_v45  ;;  %v4451_v54 = vld [vmem:[%s6398_s3 + $0x380] sm:$0xff]  }
 0x165   : > { %v1307_v11 = vrot.slane %v1285_v59, %v5776_v61  ;;  %3873 = vmatprep.subr.bf16.mxu0 %v4432_v55  ;;  %3895 = vmatprep.subr.bf16.mxu1 %v4433_v57  ;;  %v4454_v59 = vld [vmem:[%s6398_s3 + $0x308] sm:$0xff]  }
 0x166   : > { %v1314_v22 = vrot.slane %v1286_v63, %v5776_v61  ;;  %v4457_v63 = vld [vmem:[%s6398_s3 + $0x3d0] sm:$0xff]  }
 0x168   : > { %v1316_v23 = vcombine.low %v1307_v11, %v1314_v22  ;;  %3874 = vmatpush3.bf16.msra.mxu0 %v4434_v1  ;;  %3896 = vmatpush3.bf16.msra.mxu1 %v4435_v10  ;;  %v4458_v1 = vld [vmem:[%s6398_s3 + $0x310] sm:$0xff]   ;;  %v456_v11 = vrot.slane %v4629_v4, %v5760_v47  ;;  %v468_v22 = vrot.slane %v4629_v4, %v5766_v52 }
 0x169   : > { %3875 = vmatprep.subr.bf16.mxu0 %v4436_v13  ;;  %3897 = vmatprep.subr.bf16.mxu1 %v4437_v14  ;;  %v4459_v10 = vld [vmem:[%s6398_s3 + $0x390] sm:$0xff]   ;;  %v4460_v13 = vld [vmem:[%s6398_s3 + $0x358] sm:$0xff]  }
 0x16a   : > { %v1330_v29 = vrot.slane %v1316_v23, %v5776_v61  ;;  %v4461_v14 = vld [vmem:[%s6398_s3 + $0x3d8] sm:$0xff]  }
 0x16c   : > { %v1331_v30 = vcombine.low %v1323_v27, %v1330_v29  ;;  %3876 = vmatpush3.bf16.msra.mxu0 %v4438_v24  ;;  %3898 = vmatpush3.bf16.msra.mxu1 %v4439_v25  ;;  %v4462_v24 = vld [vmem:[%s6398_s3 + $0x318] sm:$0xff]   ;;  %v4465_v29 = vld [vmem:[%s6398_s3 + $0x3e0] sm:$0xff]  }
 0x16d   : > { %3877 = vmatprep.subr.bf16.mxu0 %v4440_v49  ;;  %3899 = vmatprep.subr.bf16.mxu1 %v4441_v26  ;;  %v4463_v25 = vld [vmem:[%s6398_s3 + $0x398] sm:$0xff]   ;;  %v4464_v49 = vld [vmem:[%s6398_s3 + $0x360] sm:$0xff]  }
 0x16e   : > { %v1360_v56 = vadd.f32 %v1331_v30, %v1212_v28 }
 0x170   : > { %vm1363_vm3 = vcmp.gt.f32.partialorder %v1360_v56, 0.5  ;;  %1372 = vst [vmem:[#allocation2 + $0x8] sm:$0xff] %v1360_v56  ;;  %3878 = vmatpush3.bf16.msra.mxu0 %v4442_v31  ;;  %3900 = vmatpush3.bf16.msra.mxu1 %v4443_v32 }
 0x171   : > { %v6038_v35 = vsel %vm1363_vm3, 1.0, %v4562_v17  ;;  %3879 = vmatprep.subr.bf16.mxu0 %v4444_v53  ;;  %3901 = vmatprep.subr.bf16.mxu1 %v4445_v12  ;;  %v1201_v53 = vld [vmem:[#allocation2 + $0x10] sm:$0xf]  ;;  %v1207_v12 = vld [vmem:[#allocation3 + $0x10] sm:$0xf] }
 0x172   : > { %1375 = vst [vmem:[#allocation3 + $0x8] sm:$0xff] %v6038_v35  ;;  %v1419_v38 = vrot.slane %v6038_v35, %v5764_v51  ;;  %v1427_v39 = vrot.slane %v6038_v35, %v5766_v52  ;;  %v1415_v40 = vrot.slane %v6038_v35, %v5760_v47  ;;  %v1423_v41 = vrot.slane %v6038_v35, %v5762_v50 }
 0x173   : > { %v1435_v42 = vrot.slane %v6038_v35, %v5784_v20  ;;  %v1443_v43 = vrot.slane %v6038_v35, %v5786_v21  ;;  %v4452_v20 = vld [vmem:[%s6398_s3 + $0x348] sm:$0xff]  }
 0x174   : > { %3880 = vmatpush3.bf16.msra.mxu0 %v4446_v33  ;;  %3902 = vmatpush3.bf16.msra.mxu1 %v4447_v34  ;;  %v1489_v44 = vpack.c.bf16 %v1419_v38, %v1419_v38  ;;  %v1491_v45 = vpack.c.bf16 %v1427_v39, %v1427_v39  ;;  %v1488_v46 = vpack.c.bf16 %v1415_v40, %v1415_v40  ;;  %v4453_v21 = vld [vmem:[%s6398_s3 + $0x3c8] sm:$0xff]   ;;  %v4466_v34 = vld [vmem:[%s6398_s3 + $0x320] sm:$0xff]   ;;  %v1210_v38 = vsub.f32 1.0, %v1207_v12  ;;  %v4495_v12 = vld [vmem:[%s6398_s3 + $0x498] sm:$0xff]  }
 0x175   : > { %3909 = vmatprep.subr.bf16.mxu0 %v4448_v36  ;;  %3931 = vmatprep.subr.bf16.mxu1 %v4449_v37  ;;  %v1490_v55 = vpack.c.bf16 %v1423_v41, %v1423_v41  ;;  %v1493_v57 = vpack.c.bf16 %v1435_v42, %v1435_v42  ;;  %v1495_v58 = vpack.c.bf16 %v1443_v43, %v1443_v43  ;;  %v4467_v36 = vld [vmem:[%s6398_s3 + $0x3a0] sm:$0xff]   ;;  %v1204_v37 = vmul.f32 0.2, %v1201_v53  ;;  %v4468_v40 = vld [vmem:[%s6398_s3 + $0x368] sm:$0xff]   ;;  %v4494_v53 = vld [vmem:[%s6398_s3 + $0x418] sm:$0xff]  }
 0x176   : > { %2972 = vmatprep.mubr.bf16.mxu0 %v1489_v44  ;;  %3012 = vmatprep.mubr.bf16.mxu1 %v1491_v45  ;;  %v4469_v41 = vld [vmem:[%s6398_s3 + $0x3e8] sm:$0xff]  }
 0x177   : > { %2973 = vmatmul.mubr.bf16.vlgmr.msra.gmra.mrb[20].mxu0 %v1488_v46  ;;  %3013 = vmatmul.mubr.bf16.vlgmr.msra.gmra.mrb[20].mxu1 %v1490_v55  ;;  %v4470_v44 = vld [vmem:[%s6398_s3 + $0x328] sm:$0xff]   ;;  %v1213_v46 = vmul.f32 %v1210_v38, %v1204_v37  ;;  %v4473_v55 = vld [vmem:[%s6398_s3 + $0x3f0] sm:$0xff]  }
 0x178   : > { %3910 = vmatpush3.bf16.msra.mxu0 %v4450_v48  ;;  %3932 = vmatpush3.bf16.msra.mxu1 %v4451_v54  ;;  %v4471_v45 = vld [vmem:[%s6398_s3 + $0x3a8] sm:$0xff]   ;;  %v4472_v54 = vld [vmem:[%s6398_s3 + $0x370] sm:$0xff]  }
 0x179   : > { %3052 = vmatprep.mubr.bf16.mxu0 %v1493_v57  ;;  %3092 = vmatprep.mubr.bf16.mxu1 %v1495_v58  ;;  %v4475_v57 = vld [vmem:[%s6398_s3 + $0x3b0] sm:$0xff]   ;;  %v4500_v37 = vld [vmem:[%s6398_s3 + $0x468] sm:$0xff]  }
 0x17a   : > { %3911 = vmatprep.subr.bf16.mxu0 %v4452_v20  ;;  %3933 = vmatprep.subr.bf16.mxu1 %v4453_v21  ;;  %v4474_v21 = vld [vmem:[%s6398_s3 + $0x330] sm:$0xff]   ;;  %v4501_v38 = vld [vmem:[%s6398_s3 + $0x4e8] sm:$0xff]  }
 0x17c   : > { %3912 = vmatpush3.bf16.msra.mxu0 %v4454_v59  ;;  %3934 = vmatpush3.bf16.msra.mxu1 %v4455_v60  ;;  %v4476_v59 = vld [vmem:[%s6398_s3 + $0x378] sm:$0xff]  }
 0x17d   : > { %3913 = vmatprep.subr.bf16.mxu0 %v4456_v62  ;;  %3935 = vmatprep.subr.bf16.mxu1 %v4457_v63  ;;  %v4477_v60 = vld [vmem:[%s6398_s3 + $0x3f8] sm:$0xff]  }
 0x17e   : > { %v4478_v63 = vld [vmem:[%s6398_s3 + $0x338] sm:$0xff]  }
 0x17f   : > { %v1123_v23 = vpop.f32.mrb[8].mxu0 }
 0x180   : > { %3914 = vmatpush3.bf16.msra.mxu0 %v4458_v1  ;;  %3936 = vmatpush3.bf16.msra.mxu1 %v4459_v10  ;;  %v1124_v26 = vadd.f32 %v1123_v23, %v456_v11  ;;  %v1194_v27 = vpop.f32.mrb[8].mxu1  ;;  %v1125_v28 = vpop.f32.mrb[9].mxu0  ;;  %v4479_v1 = vld [vmem:[%s6398_s3 + $0x3b8] sm:$0xff]   ;;  %v1431_v10 = vrot.slane %v6038_v35, %v5780_v18  ;;  %v1439_v11 = vrot.slane %v6038_v35, %v5782_v19  ;;  %v4482_v18 = vld [vmem:[%s6398_s3 + $0x400] sm:$0xff]   ;;  %v4484_v23 = vld [vmem:[%s6398_s3 + $0x448] sm:$0xff]  }
 0x181   : > { %3915 = vmatprep.subr.bf16.mxu0 %v4460_v13  ;;  %3937 = vmatprep.subr.bf16.mxu1 %v4461_v14  ;;  %v1195_v30 = vadd.f32 %v1194_v27, %v464_v15  ;;  %v1126_v31 = vadd.f32 %v1125_v28, %v460_v16  ;;  %v1196_v32 = vpop.f32.mrb[9].mxu1  ;;  %v4480_v13 = vld [vmem:[%s6398_s3 + $0x440] sm:$0xff]   ;;  %v4488_v27 = vld [vmem:[%s6398_s3 + $0x450] sm:$0xff]  }
 0x182   : > { %v1197_v56 = vadd.f32 %v1196_v32, %v468_v22  ;;  %v4481_v14 = vld [vmem:[%s6398_s3 + $0x4c0] sm:$0xff]   ;;  %v1492_v35 = vpack.c.bf16 %v1431_v10, %v1431_v10  ;;  %v1494_v22 = vpack.c.bf16 %v1439_v11, %v1439_v11  ;;  %v4489_v28 = vld [vmem:[%s6398_s3 + $0x4d0] sm:$0xff]   ;;  %v4493_v32 = vld [vmem:[%s6398_s3 + $0x4d8] sm:$0xff]  }
 0x183   : > { %v1332_v33 = vcombine.low %v1124_v26, %v1126_v31  ;;  %v4483_v19 = vld [vmem:[%s6398_s3 + $0x480] sm:$0xff]   ;;  %v4487_v26 = vld [vmem:[%s6398_s3 + $0x488] sm:$0xff]   ;;  %v4492_v31 = vld [vmem:[%s6398_s3 + $0x458] sm:$0xff]  }
 0x184   : > { %3916 = vmatpush3.bf16.msra.mxu0 %v4462_v24  ;;  %3938 = vmatpush3.bf16.msra.mxu1 %v4463_v25  ;;  %v1333_v39 = vcombine.low %v1195_v30, %v1197_v56  ;;  %v4491_v30 = vld [vmem:[%s6398_s3 + $0x490] sm:$0xff]   ;;  %v4496_v56 = vld [vmem:[%s6398_s3 + $0x460] sm:$0xff]  }
 0x185   : > { %3917 = vmatprep.subr.bf16.mxu0 %v4464_v49  ;;  %3939 = vmatprep.subr.bf16.mxu1 %v4465_v29  ;;  %v1340_v42 = vrot.slane %v1332_v33, %v5776_v61  ;;  %v4486_v49 = vld [vmem:[%s6398_s3 + $0x408] sm:$0xff]   ;;  %v4490_v29 = vld [vmem:[%s6398_s3 + $0x410] sm:$0xff]   ;;  %v4497_v33 = vld [vmem:[%s6398_s3 + $0x4e0] sm:$0xff]  }
 0x186   : > { %v1347_v43 = vrot.slane %v1333_v39, %v5776_v61  ;;  %v4502_v39 = vld [vmem:[%s6398_s3 + $0x428] sm:$0xff]   ;;  %v4521_v10 = vld [vmem:[%s6400_s5 + $0x30] ss:$8 sps:$4 sm:$0xff]  }
 0x187   : > { %v4526_v11 = vld [vmem:[%s6400_s5 + $0x44] ss:$8 sps:$4 sm:$0xff]  }
 0x188   : > { %3918 = vmatpush3.bf16.msra.mxu0 %v4466_v34  ;;  %3940 = vmatpush3.bf16.msra.mxu1 %v4467_v36  ;;  %v1348_v48 = vcombine.low %v1340_v42, %v1347_v43  ;;  %v4498_v34 = vld [vmem:[%s6398_s3 + $0x420] sm:$0xff]   ;;  %v4505_v42 = vld [vmem:[%s6398_s3 + $0x4f0] sm:$0xff]  }
 0x189   : > { %3919 = vmatprep.subr.bf16.mxu0 %v4468_v40  ;;  %3941 = vmatprep.subr.bf16.mxu1 %v4469_v41  ;;  %v4499_v36 = vld [vmem:[%s6398_s3 + $0x4a0] sm:$0xff]   ;;  %v4503_v40 = vld [vmem:[%s6398_s3 + $0x4a8] sm:$0xff]   ;;  %v4504_v41 = vld [vmem:[%s6398_s3 + $0x470] sm:$0xff]  }
 0x18a   : > { %v1355_v20 = vrot.slane %v1348_v48, %v5776_v61  ;;  %v4506_v43 = vld [vmem:[%s6398_s3 + $0x430] sm:$0xff]   ;;  %v4510_v48 = vld [vmem:[%s6398_s3 + $0x438] sm:$0xff]  }
 0x18c   : > { %3920 = vmatpush3.bf16.msra.mxu0 %v4470_v44  ;;  %3942 = vmatpush3.bf16.msra.mxu1 %v4471_v45  ;;  %v1361_v58 = vadd.f32 %v1355_v20, %v1213_v46  ;;  %v4507_v44 = vld [vmem:[%s6398_s3 + $0x4b0] sm:$0xff]   ;;  %v4508_v45 = vld [vmem:[%s6398_s3 + $0x478] sm:$0xff]  }
 0x18d   : > { %3921 = vmatprep.subr.bf16.mxu0 %v4472_v54  ;;  %3943 = vmatprep.subr.bf16.mxu1 %v4473_v55  ;;  %v4509_v46 = vld [vmem:[%s6398_s3 + $0x4f8] sm:$0xff]  }
 0x18e   : > { %1373 = vst.msk [vmem:[#allocation2 + $0x10] sm:$0xf] %vm4647_vm0, %v1361_v58  ;;  %vm1364_vm4 = vcmp.gt.f32.partialorder %v1361_v58, 0.5  ;;  %v4511_v54 = vld [vmem:[%s6398_s3 + $0x4b8] sm:$0xff]   ;;  %v4512_v58 = vld [vmem:[%s6400_s5] ss:$8 sps:$4 sm:$0xff]  }
 0x18f   : > { %v6157_v62 = vsel %vm1364_vm4, 1.0, %v4562_v17 }
 0x190   : > { %3922 = vmatpush3.bf16.msra.mxu0 %v4474_v21  ;;  %3944 = vmatpush3.bf16.msra.mxu1 %v4475_v57  ;;  %1376 = vst.msk [vmem:[#allocation3 + $0x10] sm:$0xf] %vm4647_vm0, %v6157_v62  ;;  %v1451_v15 = vrot.slane %v6157_v62, %v5764_v51  ;;  %v1459_v16 = vrot.slane %v6157_v62, %v5766_v52  ;;  %v4485_v52 = vld [vmem:[%s6398_s3 + $0x4c8] sm:$0xff]  }
 0x191   : > { %3923 = vmatprep.subr.bf16.mxu0 %v4476_v59  ;;  %3945 = vmatprep.subr.bf16.mxu1 %v4477_v60  ;;  %v1447_v55 = vrot.slane %v6157_v62, %v5760_v47  ;;  %v1455_v20 = vrot.slane %v6157_v62, %v5762_v50  ;;  %v4514_v59 = vld [vmem:[%s6400_s5 + $0x4] ss:$8 sps:$4 sm:$0xff]   ;;  %v4517_v60 = vld [vmem:[%s6400_s5 + $0x14] ss:$8 sps:$4 sm:$0xff]   ;;  %v4515_v50 = vld [vmem:[%s6400_s5 + $0x10] ss:$8 sps:$4 sm:$0xff]  }
 0x192   : > { %v1497_v24 = vpack.c.bf16 %v1451_v15, %v1451_v15  ;;  %v1499_v25 = vpack.c.bf16 %v1459_v16, %v1459_v16  ;;  %v4520_v62 = vld [vmem:[%s6400_s5 + $0x24] ss:$8 sps:$4 sm:$0xff]  }
 0x193   : > { %v1496_v21 = vpack.c.bf16 %v1447_v55, %v1447_v55  ;;  %v1498_v57 = vpack.c.bf16 %v1455_v20, %v1455_v20 }
 0x194   : > { %3924 = vmatpush3.bf16.msra.mxu0 %v4478_v63  ;;  %3946 = vmatpush3.bf16.msra.mxu1 %v4479_v1  ;;  %v4518_v63 = vld [vmem:[%s6400_s5 + $0x20] ss:$8 sps:$4 sm:$0xff]   ;;  %v4523_v1 = vld [vmem:[%s6400_s5 + $0x34] ss:$8 sps:$4 sm:$0xff]  }
 0x195   : > { %3953 = vmatprep.subr.bf16.mxu0 %v4480_v13  ;;  %3975 = vmatprep.subr.bf16.mxu1 %v4481_v14  ;;  %v4524_v13 = vld [vmem:[%s6400_s5 + $0x40] ss:$8 sps:$4 sm:$0xff]   ;;  %v4529_v14 = vld [vmem:[%s6400_s5 + $0x54] ss:$8 sps:$4 sm:$0xff]  }
 0x197   : > { %3053 = vmatmul.mubr.bf16.vlgmr.msra.gmra.mrb[24].mxu0 %v1492_v35  ;;  %3093 = vmatmul.mubr.bf16.vlgmr.msra.gmra.mrb[24].mxu1 %v1494_v22 }
 0x198   : > { %3954 = vmatpush3.bf16.msra.mxu0 %v4482_v18  ;;  %3976 = vmatpush3.bf16.msra.mxu1 %v4483_v19  ;;  %v4527_v18 = vld [vmem:[%s6400_s5 + $0x50] ss:$8 sps:$4 sm:$0xff]  }
 0x199   : > { %3955 = vmatprep.subr.bf16.mxu0 %v4484_v23  ;;  %3977 = vmatprep.subr.bf16.mxu1 %v4485_v52 }
 0x19a   : > { %3132 = vmatprep.mubr.bf16.mxu0 %v1497_v24  ;;  %3172 = vmatprep.mubr.bf16.mxu1 %v1499_v25 }
 0x19c   : > { %3956 = vmatpush3.bf16.msra.mxu0 %v4486_v49  ;;  %3978 = vmatpush3.bf16.msra.mxu1 %v4487_v26  ;;  %v4532_v26 = vld [vmem:[%s6400_s5 + $0x64] ss:$8 sps:$4 sm:$0xff]  }
 0x19d   : > { %3957 = vmatprep.subr.bf16.mxu0 %v4488_v27  ;;  %3979 = vmatprep.subr.bf16.mxu1 %v4489_v28  ;;  %v4530_v28 = vld [vmem:[%s6400_s5 + $0x60] ss:$8 sps:$4 sm:$0xff]  }
 0x1a0   : > { %3958 = vmatpush3.bf16.msra.mxu0 %v4490_v29  ;;  %3980 = vmatpush3.bf16.msra.mxu1 %v4491_v30  ;;  %v4535_v30 = vld [vmem:[%s6400_s5 + $0x74] ss:$8 sps:$4 sm:$0xff]  }
 0x1a1   : > { %3959 = vmatprep.subr.bf16.mxu0 %v4492_v31  ;;  %3981 = vmatprep.subr.bf16.mxu1 %v4493_v32  ;;  %v4533_v31 = vld [vmem:[%s6400_s5 + $0x70] ss:$8 sps:$4 sm:$0xff]   ;;  %v4564_v32 = vmov 0  }
 0x1a4   : > { %3960 = vmatpush3.bf16.msra.mxu0 %v4494_v53  ;;  %3982 = vmatpush3.bf16.msra.mxu1 %v4495_v12  ;;  %v4536_v53 = vld [vmem:[%s6402_s7 + $0x40] sm:$0xff]  }
 0x1a5   : > { %3961 = vmatprep.subr.bf16.mxu0 %v4496_v56  ;;  %3983 = vmatprep.subr.bf16.mxu1 %v4497_v33  ;;  %v4537_v12 = vld [vmem:[%s6402_s7] sm:$0xff]   ;;  %v4538_v56 = vld [vmem:[%s6402_s7 + $0x48] sm:$0xff]  }
 0x1a6   : > { %v4539_v33 = vld [vmem:[%s6402_s7 + $0x8] sm:$0xff]  }
 0x1a8   : > { %3962 = vmatpush3.bf16.msra.mxu0 %v4498_v34  ;;  %3984 = vmatpush3.bf16.msra.mxu1 %v4499_v36  ;;  %v4540_v34 = vld [vmem:[%s6402_s7 + $0x50] sm:$0xff]  }
 0x1a9   : > { %3963 = vmatprep.subr.bf16.mxu0 %v4500_v37  ;;  %3985 = vmatprep.subr.bf16.mxu1 %v4501_v38  ;;  %v4541_v36 = vld [vmem:[%s6402_s7 + $0x10] sm:$0xff]   ;;  %v4542_v37 = vld [vmem:[%s6402_s7 + $0x58] sm:$0xff]  }
 0x1ac   : > { %3964 = vmatpush3.bf16.msra.mxu0 %v4502_v39  ;;  %3986 = vmatpush3.bf16.msra.mxu1 %v4503_v40 }
 0x1ad   : > { %3965 = vmatprep.subr.bf16.mxu0 %v4504_v41  ;;  %3987 = vmatprep.subr.bf16.mxu1 %v4505_v42 }
 0x1b0   : > { %3966 = vmatpush3.bf16.msra.mxu0 %v4506_v43  ;;  %3988 = vmatpush3.bf16.msra.mxu1 %v4507_v44 }
 0x1b1   : > { %3967 = vmatprep.subr.bf16.mxu0 %v4508_v45  ;;  %3989 = vmatprep.subr.bf16.mxu1 %v4509_v46 }
 0x1b4   : > { %3968 = vmatpush3.bf16.msra.mxu0 %v4510_v48  ;;  %3990 = vmatpush3.bf16.msra.mxu1 %v4511_v54 }
 0x1b5   : > { %3299 = vmatprep.subr.bf16.mxu0 %v4514_v59  ;;  %3997 = vmatprep.subr.bf16.mxu1 %v4536_v53 }
 0x1b7   : > { %3133 = vmatmul.mubr.bf16.vlgmr.msra.gmra.mrb[28].mxu0 %v1496_v21  ;;  %3173 = vmatmul.mubr.bf16.vlgmr.msra.gmra.mrb[28].mxu1 %v1498_v57 }
 0x1b8   : > { %3300 = vmatpush1.bf16.msra.mxu0 %v4512_v58  ;;  %3331 = vmatprep.mubr.bf16.mxu0 %v4564_v32 }
 0x1b9   : > { %3301 = vmatprep.subr.bf16.mxu0 %v4517_v60  ;;  %3998 = vmatpush3.bf16.msra.mxu1 %v4537_v12 }
 0x1ba   : > { %3999 = vmatprep.subr.bf16.mxu1 %v4538_v56 }
 0x1bc   : > { %3302 = vmatpush1.bf16.msra.mxu0 %v4515_v50 }
 0x1bd   : > { %3303 = vmatprep.subr.bf16.mxu0 %v4520_v62  ;;  %4000 = vmatpush3.bf16.msra.mxu1 %v4539_v33 }
 0x1be   : > { %4001 = vmatprep.subr.bf16.mxu1 %v4540_v34 }
 0x1c0   : > { %3304 = vmatpush1.bf16.msra.mxu0 %v4518_v63 }
 0x1c1   : > { %3305 = vmatprep.subr.bf16.mxu0 %v4523_v1  ;;  %4002 = vmatpush3.bf16.msra.mxu1 %v4541_v36 }
 0x1c2   : > { %4003 = vmatprep.subr.bf16.mxu1 %v4542_v37 }
 0x1c4   : > { %3306 = vmatpush1.bf16.msra.mxu0 %v4521_v10 }
 0x1c5   : > { %3307 = vmatprep.subr.bf16.mxu0 %v4526_v11 }
 0x1c8   : > { %3308 = vmatpush1.bf16.msra.mxu0 %v4524_v13 }
 0x1c9   : > { %3309 = vmatprep.subr.bf16.mxu0 %v4529_v14 }
 0x1cc   : > { %3310 = vmatpush1.bf16.msra.mxu0 %v4527_v18 }
 0x1cd   : > { %3311 = vmatprep.subr.bf16.mxu0 %v4532_v26  ;;  %v3182_v26 = vld [vmem:[#allocation5] sm:$0x1] }
 0x1d0   : > { %3312 = vmatpush1.bf16.msra.mxu0 %v4530_v28 }
 0x1d1   : > { %3313 = vmatprep.subr.bf16.mxu0 %v4535_v30  ;;  %v3183_v30 = vsub.f32 1.0, %v3182_v26 }
 0x1d4   : > { %3314 = vmatpush1.bf16.msra.mxu0 %v4533_v31 }
 0x20a   : > { %v3793_v15 = vpop.f32.mrb[12].mxu0  ;;  %v3815_v16 = vpop.f32.mrb[12].mxu1 }
 0x20b   : > { %v3794_v19 = vpop.f32.mrb[13].mxu0  ;;  %v3816_v35 = vpop.f32.mrb[13].mxu1 }
 0x20c   : > { %v3795_v22 = vadd.f32 %v3794_v19, %v3793_v15  ;;  %v3817_v23 = vadd.f32 %v3816_v35, %v3815_v16  ;;  %v3796_v52 = vpop.f32.mrb[14].mxu0  ;;  %v3818_v24 = vpop.f32.mrb[14].mxu1 }
 0x20d   : > { %v3797_v25 = vpop.f32.mrb[15].mxu0  ;;  %v3819_v49 = vpop.f32.mrb[15].mxu1 }
 0x20e   : > { %v2815_v27 = vadd.f32 %v3795_v22, %v4634_v5  ;;  %v3180_v49 = vld [vmem:[#allocation4] sm:$0x1] }
 0x210   : > { %v2855_v29 = vadd.f32 %v3817_v23, %v2815_v27 }
 0x22a   : > { %v3837_v38 = vpop.f32.mrb[16].mxu0  ;;  %v3859_v39 = vpop.f32.mrb[16].mxu1 }
 0x22b   : > { %v3838_v40 = vpop.f32.mrb[17].mxu0  ;;  %v3860_v41 = vpop.f32.mrb[17].mxu1 }
 0x22c   : > { %v3839_v42 = vadd.f32 %v3838_v40, %v3837_v38  ;;  %v3861_v43 = vadd.f32 %v3860_v41, %v3859_v39  ;;  %v3840_v44 = vpop.f32.mrb[18].mxu0  ;;  %v3862_v45 = vpop.f32.mrb[18].mxu1 }
 0x22d   : > { %v3841_v46 = vpop.f32.mrb[19].mxu0  ;;  %v3863_v48 = vpop.f32.mrb[19].mxu1  ;;  %v4544_v44 = vld [vmem:[%s6402_s7 + $0x60] sm:$0xff]  }
 0x22e   : > { %v2895_v54 = vadd.f32 %v3839_v42, %v2855_v29  ;;  %v3181_v29 = vmul.f32 0.2, %v3180_v49  ;;  %v4565_v42 = vmov 1.0|1.0   ;;  %v4545_v45 = vld [vmem:[%s6402_s7 + $0x20] sm:$0xff]   ;;  %v4546_v46 = vld [vmem:[%s6402_s7 + $0x68] sm:$0xff]  }
 0x22f   : > { %v4547_v48 = vld [vmem:[%s6402_s7 + $0x28] sm:$0xff]  }
 0x230   : > { %v2935_v55 = vadd.f32 %v3861_v43, %v2895_v54  ;;  %v3184_v38 = vmul.f32 %v3183_v30, %v3181_v29  ;;  %v4543_v43 = vld [vmem:[%s6402_s7 + $0x18] sm:$0xff]   ;;  %v4548_v54 = vld [vmem:[%s6402_s7 + $0x70] sm:$0xff]   ;;  %v3550_v49 = vld [vmem:[#allocation8] sm:$0x1] }
 0x231   : > { %4004 = vmatpush3.bf16.msra.mxu1 %v4543_v43  ;;  %v3551_v26 = vmul.f32 0.2, %v3550_v49 }
 0x232   : > { %4005 = vmatprep.subr.bf16.mxu1 %v4544_v44 }
 0x235   : > { %4006 = vmatpush3.bf16.msra.mxu1 %v4545_v45 }
 0x236   : > { %4007 = vmatprep.subr.bf16.mxu1 %v4546_v46 }
 0x239   : > { %4008 = vmatpush3.bf16.msra.mxu1 %v4547_v48 }
 0x23a   : > { %4009 = vmatprep.subr.bf16.mxu1 %v4548_v54 }
 0x24a   : > { %v3881_v20 = vpop.f32.mrb[20].mxu0  ;;  %v3903_v21 = vpop.f32.mrb[20].mxu1 }
 0x24b   : > { %v3882_v57 = vpop.f32.mrb[21].mxu0  ;;  %v3904_v58 = vpop.f32.mrb[21].mxu1 }
 0x24c   : > { %v3883_v59 = vadd.f32 %v3882_v57, %v3881_v20  ;;  %v3905_v60 = vadd.f32 %v3904_v58, %v3903_v21  ;;  %v3884_v50 = vpop.f32.mrb[22].mxu0  ;;  %v3906_v62 = vpop.f32.mrb[22].mxu1  ;;  %v4550_v20 = vld [vmem:[%s6402_s7 + $0x78] sm:$0xff]   ;;  %v3292_v57 = vrot.slane %v4639_v6, %v5760_v47  ;;  %v3296_v58 = vrot.slane %v4639_v6, %v5764_v51 }
 0x24d   : > { %v3885_v63 = vpop.f32.mrb[23].mxu0  ;;  %v3907_v1 = vpop.f32.mrb[23].mxu1  ;;  %v4551_v21 = vld [vmem:[%s6402_s7 + $0x38] sm:$0xff]  }
 0x24e   : > { %v2975_v10 = vadd.f32 %v3883_v59, %v2935_v55  ;;  %v4549_v55 = vld [vmem:[%s6402_s7 + $0x30] sm:$0xff]   ;;  %v3340_v59 = vld [vmem:[#allocation6] sm:$0x3] }
 0x24f   : > { %4010 = vmatpush3.bf16.msra.mxu1 %v4549_v55 }
 0x250   : > { %v3015_v11 = vadd.f32 %v3905_v60, %v2975_v10  ;;  %4011 = vmatprep.subr.bf16.mxu1 %v4550_v20  ;;  %v3342_v60 = vld [vmem:[#allocation7] sm:$0x3]  ;;  %v3341_v10 = vmul.f32 0.2, %v3340_v59 }
 0x253   : > { %4012 = vmatpush3.bf16.msra.mxu1 %v4551_v21 }
 0x26a   : > { %v3925_v13 = vpop.f32.mrb[24].mxu0  ;;  %v3947_v14 = vpop.f32.mrb[24].mxu1 }
 0x26b   : > { %v3926_v15 = vpop.f32.mrb[25].mxu0  ;;  %v3948_v16 = vpop.f32.mrb[25].mxu1 }
 0x26c   : > { %v3927_v18 = vadd.f32 %v3926_v15, %v3925_v13  ;;  %v3949_v19 = vadd.f32 %v3948_v16, %v3947_v14  ;;  %v3928_v35 = vpop.f32.mrb[26].mxu0  ;;  %v3950_v22 = vpop.f32.mrb[26].mxu1 }
 0x26d   : > { %v3929_v23 = vpop.f32.mrb[27].mxu0  ;;  %v3951_v52 = vpop.f32.mrb[27].mxu1 }
 0x26e   : > { %v3055_v24 = vadd.f32 %v3927_v18, %v3015_v11  ;;  %v3343_v11 = vsub.f32 1.0, %v3342_v60 }
 0x270   : > { %v3095_v25 = vadd.f32 %v3949_v19, %v3055_v24  ;;  %v3344_v16 = vmul.f32 %v3343_v11, %v3341_v10 }
 0x28a   : > { %v3969_v27 = vpop.f32.mrb[28].mxu0  ;;  %v3991_v28 = vpop.f32.mrb[28].mxu1 }
 0x28b   : > { %v3970_v31 = vpop.f32.mrb[29].mxu0  ;;  %v3992_v32 = vpop.f32.mrb[29].mxu1 }
 0x28c   : > { %v3971_v53 = vadd.f32 %v3970_v31, %v3969_v27  ;;  %v3993_v12 = vadd.f32 %v3992_v32, %v3991_v28  ;;  %v3972_v56 = vpop.f32.mrb[30].mxu0  ;;  %v3994_v33 = vpop.f32.mrb[30].mxu1 }
 0x28d   : > { %v3973_v34 = vpop.f32.mrb[31].mxu0  ;;  %v3995_v36 = vpop.f32.mrb[31].mxu1 }
 0x28e   : > { %v3135_v37 = vadd.f32 %v3971_v53, %v3095_v25 }
 0x290   : > { %v3175_v39 = vadd.f32 %v3993_v12, %v3135_v37 }
 0x292   : > { %v3185_v40 = vadd.f32 %v3184_v38, %v3175_v39 }
 0x294   : > { %vm3186_vm5 = vcmp.gt.f32.partialorder %v3185_v40, 0.5  ;;  %3189 = vst [vmem:[#allocation4] sm:$0x1] %v3185_v40 }
 0x295   : > { %v3740_v41 = vsel %vm3186_vm5, 1.0, %v4562_v17  ;;  %vm3757_vm6 = vmpackc.low %vm3186_vm5, %vm3186_vm5 }
 0x296   : > { %3190 = vst [vmem:[#allocation5] sm:$0x1] %v3740_v41  ;;  %3758 = vmatmul.mubr.msk.bf16.vlgmr.msra.gmra.mrb[32].mxu0 %vm3757_vm6, %v4565_v42 }
 0x369   : > { %v3333_v50 = vpop.f32.mrb[32].mxu0 }
 0x36a   : > { %v3334_v62 = vadd.f32 %v3333_v50, %v3292_v57  ;;  %v3335_v63 = vpop.f32.mrb[33].mxu0 }
 0x36b   : > { %v3336_v1 = vadd.f32 %v3335_v63, %v3296_v58  ;;  %v3337_v13 = vpop.f32.mrb[34].mxu0 }
 0x36c   : > { %v3338_v14 = vpop.f32.mrb[35].mxu0 }
 0x36d   : > { %v3347_v15 = vcombine.low %v3334_v62, %v3336_v1 }
 0x36f   : > { %v3354_v18 = vrot.slane %v3347_v15, %v5776_v61 }
 0x371   : > { %v3361_v19 = vrot.slane %v3354_v18, %v5776_v61  ;;  %v3552_v61 = vld [vmem:[#allocation9] sm:$0x1] }
 0x372   : > { %v3553_v27 = vsub.f32 1.0, %v3552_v61 }
 0x373   : > { %v3363_v35 = vadd.f32 %v3361_v19, %v3344_v16 }
 0x374   : > { %v3554_v31 = vmul.f32 %v3553_v27, %v3551_v26 }
 0x375   : > { %3367 = vst.msk [vmem:[#allocation6] sm:$0x3] %vm4652_vm1, %v3363_v35  ;;  %vm3364_vm7 = vcmp.gt.f32.partialorder %v3363_v35, 0.5 }
 0x376   : > { %v3759_v22 = vsel %vm3364_vm7, 1.0, %v4562_v17 }
 0x377   : > { %3368 = vst.msk [vmem:[#allocation7] sm:$0x3] %vm4652_vm1, %v3759_v22  ;;  %v3377_v23 = vrot.slane %v3759_v22, %v5764_v51  ;;  %v3373_v52 = vrot.slane %v3759_v22, %v5760_v47  ;;  %v3561_v51 = vld [vmem:[#allocation10] sm:$0x1] }
 0x379   : > { %v3381_v24 = vpack.c.bf16 %v3377_v23, %v3377_v23  ;;  %v3380_v25 = vpack.c.bf16 %v3373_v52, %v3373_v52 }
 0x37b   : > { %3542 = vmatprep.mubr.bf16.mxu1 %v3381_v24 }
 0x37c   : > { %3543 = vmatmul.mubr.bf16.vlgmr.msra.gmra.mrb[32].mxu1 %v3380_v25 }
 0x44f   : > { %v4013_v28 = vpop.f32.mrb[32].mxu1 }
 0x450   : > { %v4014_v29 = vpop.f32.mrb[33].mxu1 }
 0x451   : > { %v4015_v30 = vadd.f32 %v4014_v29, %v4013_v28  ;;  %v4016_v32 = vpop.f32.mrb[34].mxu1 }
 0x452   : > { %v4017_v53 = vpop.f32.mrb[35].mxu1 }
 0x453   : > { %v3545_v12 = vadd.f32 %v4015_v30, %v4644_v7 }
 0x455   : > { %v3555_v56 = vadd.f32 %v3554_v31, %v3545_v12  ;;  %62 = sbr.rel (!%p60_p0) target bundleno = 8 (0x8), region = 64 }
 0x457   : > { %vm3556_vm8 = vcmp.gt.f32.partialorder %v3555_v56, 0.5  ;;  %3559 = vst [vmem:[#allocation8] sm:$0x1] %v3555_v56 }
 0x458   : > { %v3776_v47 = vsel %vm3556_vm8, 1.0, %v4562_v17 }
 0x459   : > { %3560 = vst [vmem:[#allocation9] sm:$0x1] %v3776_v47  ;;  %v3562_v33 = vadd.f32 %v3776_v47, %v3561_v51 }
 0x45b   : > { %3563 = vst [vmem:[#allocation10] sm:$0x1] %v3562_v33 }
 0x462   :  { %v3564_v34 = vld [vmem:[#allocation10] sm:$0x1] }
 0x463   :  { %v3565_v36 = vmul.f32 0.125, %v3564_v34 }
 0x465   :  { %3566 = vst [vmem:[%s6404_s9] sm:$0x1] %v3565_v36 }

</bundles_post_ra>
